<compile_context>
chip_gen: v7x
topology: tpu7x:2x2x1
jax: 0.10.0
libtpu: 0.0.40
codegen_flags: <defaults>
</compile_context>

<pallas_src>
import functools

import jax
import jax.numpy as jnp
from jax.experimental import pallas as pl
from jax.experimental.pallas import tpu as pltpu


def _silu(v):
    # sigmoid(v) = 0.5 * (1 + tanh(0.5 * v)): a single EUP op per element
    # (vs. exp + reciprocal = two); the extra mul/add ride idle VPU slots.
    return v * (0.5 * jnp.tanh(0.5 * v) + 0.5)


def flat_kernel(x_ref, c_ref,
                w_in_ref, b_in_ref,      # packed: (cat_dim, 2*D) bf16, (1, 2*D) f32
                w_out_ref, b_out_ref,    # packed: (cat_dim, 2*D) bf16, (1, 2*D) f32
                o_ref,
                cat_ref):                # VMEM scratch (tile_b, cat_dim) bf16
    D = x_ref.shape[-1]
    xf = x_ref[...].astype(jnp.float32)        # residual kept in f32

    # Assemble cat([x, const]) once in bf16; the const half is reused by both arms.
    cat_ref[:, :D] = x_ref[...].astype(cat_ref.dtype)
    cat_ref[:, D:] = c_ref[...].astype(cat_ref.dtype)

    # ---- wedge_in: one fused (tile_b, cat) @ (cat, 2D) bf16 MXU matmul ------
    h1 = (jnp.dot(cat_ref[...], w_in_ref[...],
                  preferred_element_type=jnp.float32) + b_in_ref[...])
    z = _silu(h1[:, :D]) * h1[:, D:]           # slices at lane-128 boundary: free

    # ---- wedge_out ----------------------------------------------------------
    xz = xf + _silu(z)
    cat_ref[:, :D] = xz.astype(cat_ref.dtype)  # overwrite x-half only; reuse const half

    h2 = (jnp.dot(cat_ref[...], w_out_ref[...],
                  preferred_element_type=jnp.float32) + b_out_ref[...])
    z2 = _silu(h2[:, :D]) * h2[:, D:]

    o_ref[...] = (xf + z2).astype(o_ref.dtype)


def _round_up(v, m):
    return ((v + m - 1) // m) * m


@functools.partial(jax.jit, static_argnames=("tile_b",))
def flat_forward(x, const, params, *, tile_b=128):
    """x: (B, in_dim), const: (B, const_dim) -> (B, in_dim)."""
    B, D = x.shape
    Dc = const.shape[-1]
    cat_dim = D + Dc
    # Packed SwiGLU layout (and the free h[:, :D]/h[:, D:] slicing) requires
    # lane-128-aligned feature dims.
    assert D % 128 == 0 and Dc % 128 == 0, "in_dim/const_dim must be multiples of 128"

    # Batch tile: multiple of 8 sublanes, no bigger than the (rounded) batch,
    # and capped so grid_b >= 2 whenever possible (keeps both v7x TCs busy).
    tile_b = _round_up(tile_b, 8)
    tile_b = min(tile_b, _round_up(B, 8))
    tile_b = min(tile_b, max(8, _round_up(pl.cdiv(B, 2), 8)))
    grid_b = pl.cdiv(B, tile_b)   # partial tail block is masked by Pallas on write

    # Feed the MXU bf16 (f32 accumulate); biases stay f32, added post-accumulate.
    w_in = params["w_in"].astype(jnp.bfloat16)
    w_out = params["w_out"].astype(jnp.bfloat16)
    b_in = params["b_in"].astype(jnp.float32)
    b_out = params["b_out"].astype(jnp.float32)

    row_x = pl.BlockSpec((tile_b, D), lambda i: (i, 0))
    row_c = pl.BlockSpec((tile_b, Dc), lambda i: (i, 0))
    full = lambda a: pl.BlockSpec(a.shape, lambda i: (0, 0))  # grid-invariant

    itemsize = jnp.dtype(x.dtype).itemsize
    cost = pl.CostEstimate(
        flops=2 * 2 * B * cat_dim * (2 * D),      # two (B,cat)@(cat,2D) matmuls
        transcendentals=3 * B * D,                # three silu (tanh) applications
        bytes_accessed=(x.size + const.size + B * D) * itemsize
        + (w_in.size + w_out.size) * 2 + (b_in.size + b_out.size) * 4,
    )

    return pl.pallas_call(
        flat_kernel,
        out_shape=jax.ShapeDtypeStruct((B, D), x.dtype),
        grid_spec=pltpu.PrefetchScalarGridSpec(
            num_scalar_prefetch=0,
            grid=(grid_b,),
            in_specs=[row_x, row_c,
                      full(w_in), full(b_in), full(w_out), full(b_out)],
            out_specs=row_x,
            scratch_shapes=[pltpu.VMEM((tile_b, cat_dim), jnp.bfloat16)],
        ),
        compiler_params=pltpu.CompilerParams(
            dimension_semantics=("parallel",)),
        cost_estimate=cost,
    )(x, const, w_in, b_in, w_out, b_out)


def init_params(key, in_dim, const_dim, weight_dtype=jnp.bfloat16):
    """nn.Linear-style init; weights stored (in_features, out_features).

    Swish and gate branches are packed along the output axis:
      w_* : (in_dim + const_dim, 2*in_dim)   columns [0:D]=swish, [D:2D]=gate (bf16)
      b_* : (1, 2*in_dim)                    (f32)
    """
    cat_dim = in_dim + const_dim
    bound = 1.0 / (cat_dim ** 0.5)
    keys = jax.random.split(key, 8)

    def u(k, shape, dtype):
        return jax.random.uniform(k, shape, jnp.float32, -bound, bound).astype(dtype)

    def pack(kw_s, kw_g, kb_s, kb_g):
        w = jnp.concatenate([u(kw_s, (cat_dim, in_dim), weight_dtype),
                             u(kw_g, (cat_dim, in_dim), weight_dtype)], axis=1)
        b = jnp.concatenate([u(kb_s, (1, in_dim), jnp.float32),
                             u(kb_g, (1, in_dim), jnp.float32)], axis=1)
        return w, b

    w_in, b_in = pack(keys[0], keys[1], keys[2], keys[3])
    w_out, b_out = pack(keys[4], keys[5], keys[6], keys[7])
    return dict(w_in=w_in, b_in=b_in, w_out=w_out, b_out=b_out)


def flat_reference(x, const, p):
    """Pure-JAX f32 reference mirroring the PyTorch forward (dropout = 0)."""
    D = x.shape[-1]

    def swiglu(h, w, b):
        y = h @ w.astype(jnp.float32) + b.astype(jnp.float32)
        return jax.nn.silu(y[:, :D]) * y[:, D:]

    z = swiglu(jnp.concatenate([x, const], -1), p["w_in"], p["b_in"])
    z2 = swiglu(jnp.concatenate([x + jax.nn.silu(z), const], -1),
                p["w_out"], p["b_out"])
    return x + z2


if __name__ == "__main__":
    # Ragged batch (not a multiple of the tile) exercises the masked tail block;
    # in_dim/const_dim kept at one lane-tile (128) so shapes stay small.
    in_dim, const_dim, batch = 128, 128, 200

    key = jax.random.PRNGKey(0)
    kx, kc, kp = jax.random.split(key, 3)
    x = jax.random.normal(kx, (batch, in_dim), jnp.float32)
    const = jax.random.normal(kc, (batch, const_dim), jnp.float32)
    params = init_params(kp, in_dim, const_dim)

    out = flat_forward(x, const, params, tile_b=128)
    out = jax.block_until_ready(out)

    ref = flat_reference(x, const, params)
    assert out.shape == (batch, in_dim)
    # Tolerance covers bf16 MXU inputs (f32 accumulate) vs the pure-f32 reference.
    assert jnp.allclose(out, ref, atol=2e-2, rtol=2e-2), "mismatch vs reference"

    print("KERNEL_OK")
</pallas_src>

<mosaic_0001>
module attributes {stable_mosaic.version = 11 : i64} {
  func.func @flat_kernel(%arg0: i32, %arg1: memref<104x128xf32, #tpu.memory_space<vmem>>, %arg2: memref<104x128xf32, #tpu.memory_space<vmem>>, %arg3: memref<256x256xbf16, #tpu.memory_space<vmem>>, %arg4: memref<1x256xf32, #tpu.memory_space<vmem>>, %arg5: memref<256x256xbf16, #tpu.memory_space<vmem>>, %arg6: memref<1x256xf32, #tpu.memory_space<vmem>>, %arg7: memref<104x128xf32, #tpu.memory_space<vmem>>, %arg8: memref<104x256xbf16, #tpu.memory_space<vmem>>) attributes {dimension_semantics = [#tpu.dimension_semantics<parallel>], iteration_bounds = array<i64: 2>, scalar_prefetch = 0 : i64, scratch_operands = 1 : i64, tpu.core_type = #tpu.core_type<tc>, window_params = [{transform_indices = @transform_0, window_bounds = array<i64: 104, 128>}, {transform_indices = @transform_1, window_bounds = array<i64: 104, 128>}, {pipeline_mode = #tpu.pipeline_mode<synchronous>, transform_indices = @transform_2, window_bounds = array<i64: 256, 256>}, {pipeline_mode = #tpu.pipeline_mode<synchronous>, transform_indices = @transform_3, window_bounds = array<i64: 1, 256>}, {pipeline_mode = #tpu.pipeline_mode<synchronous>, transform_indices = @transform_4, window_bounds = array<i64: 256, 256>}, {pipeline_mode = #tpu.pipeline_mode<synchronous>, transform_indices = @transform_5, window_bounds = array<i64: 1, 256>}, {transform_indices = @transform_6, window_bounds = array<i64: 104, 128>}]} {
    %c0 = arith.constant 0 : index
    %c0_0 = arith.constant 0 : index
    %0 = vector.load %arg1[%c0, %c0_0] : memref<104x128xf32, #tpu.memory_space<vmem>>, vector<104x128xf32>
    %c0_1 = arith.constant 0 : index
    %c0_2 = arith.constant 0 : index
    %1 = vector.load %arg1[%c0_1, %c0_2] : memref<104x128xf32, #tpu.memory_space<vmem>>, vector<104x128xf32>
    %2 = arith.truncf %1 : vector<104x128xf32> to vector<104x128xbf16>
    %c0_3 = arith.constant 0 : index
    %c0_4 = arith.constant 0 : index
    %3 = vector.load %arg8[%c0_3, %c0_4] : memref<104x256xbf16, #tpu.memory_space<vmem>>, vector<104x128xbf16>
    tpu.vector_store %arg8[%c0_3, %c0_4], %2 {strides = array<i32>} : memref<104x256xbf16, #tpu.memory_space<vmem>>, vector<104x128xbf16>,
    %c0_5 = arith.constant 0 : index
    %c0_6 = arith.constant 0 : index
    %4 = vector.load %arg2[%c0_5, %c0_6] : memref<104x128xf32, #tpu.memory_space<vmem>>, vector<104x128xf32>
    %5 = arith.truncf %4 : vector<104x128xf32> to vector<104x128xbf16>
    %c0_7 = arith.constant 0 : index
    %c128 = arith.constant 128 : index
    %6 = vector.load %arg8[%c0_7, %c128] : memref<104x256xbf16, #tpu.memory_space<vmem>>, vector<104x128xbf16>
    tpu.vector_store %arg8[%c0_7, %c128], %5 {strides = array<i32>} : memref<104x256xbf16, #tpu.memory_space<vmem>>, vector<104x128xbf16>,
    %c0_8 = arith.constant 0 : index
    %c0_9 = arith.constant 0 : index
    %7 = vector.load %arg8[%c0_8, %c0_9] : memref<104x256xbf16, #tpu.memory_space<vmem>>, vector<104x256xbf16>
    %c0_10 = arith.constant 0 : index
    %c0_11 = arith.constant 0 : index
    %8 = vector.load %arg3[%c0_10, %c0_11] : memref<256x256xbf16, #tpu.memory_space<vmem>>, vector<256x256xbf16>
    %cst = arith.constant dense<0.000000e+00> : vector<104x256xf32>
    %9 = tpu.matmul %7, %8, %cst {dimension_numbers = #tpu.dot_dimension_numbers<[1], [0], [0], [1], [0, 0, 1, 1], [], []>} : vector<104x256xbf16>, vector<256x256xbf16>, vector<104x256xf32> -> vector<104x256xf32>
    %c0_12 = arith.constant 0 : index
    %c0_13 = arith.constant 0 : index
    %10 = vector.load %arg4[%c0_12, %c0_13] : memref<1x256xf32, #tpu.memory_space<vmem>>, vector<1x256xf32>
    %11 = vector.broadcast %10 : vector<1x256xf32> to vector<104x256xf32>
    %12 = arith.addf %9, %11 : vector<104x256xf32>
    %13 = vector.extract_strided_slice %12 {offsets = [0, 0], sizes = [104, 128], strides = [1, 1]} : vector<104x256xf32> to vector<104x128xf32>
    %cst_14 = arith.constant 5.000000e-01 : f32
    %14 = vector.broadcast %cst_14 : f32 to vector<104x128xf32>
    %15 = arith.mulf %14, %13 : vector<104x128xf32>
    %16 = math.tanh %15 : vector<104x128xf32>
    %cst_15 = arith.constant 5.000000e-01 : f32
    %17 = vector.broadcast %cst_15 : f32 to vector<104x128xf32>
    %18 = arith.mulf %17, %16 : vector<104x128xf32>
    %cst_16 = arith.constant 5.000000e-01 : f32
    %19 = vector.broadcast %cst_16 : f32 to vector<104x128xf32>
    %20 = arith.addf %18, %19 : vector<104x128xf32>
    %21 = arith.mulf %13, %20 : vector<104x128xf32>
    %22 = vector.extract_strided_slice %12 {offsets = [0, 128], sizes = [104, 128], strides = [1, 1]} : vector<104x256xf32> to vector<104x128xf32>
    %23 = arith.mulf %21, %22 : vector<104x128xf32>
    %cst_17 = arith.constant 5.000000e-01 : f32
    %24 = vector.broadcast %cst_17 : f32 to vector<104x128xf32>
    %25 = arith.mulf %24, %23 : vector<104x128xf32>
    %26 = math.tanh %25 : vector<104x128xf32>
    %cst_18 = arith.constant 5.000000e-01 : f32
    %27 = vector.broadcast %cst_18 : f32 to vector<104x128xf32>
    %28 = arith.mulf %27, %26 : vector<104x128xf32>
    %cst_19 = arith.constant 5.000000e-01 : f32
    %29 = vector.broadcast %cst_19 : f32 to vector<104x128xf32>
    %30 = arith.addf %28, %29 : vector<104x128xf32>
    %31 = arith.mulf %23, %30 : vector<104x128xf32>
    %32 = arith.addf %0, %31 : vector<104x128xf32>
    %33 = arith.truncf %32 : vector<104x128xf32> to vector<104x128xbf16>
    %c0_20 = arith.constant 0 : index
    %c0_21 = arith.constant 0 : index
    %34 = vector.load %arg8[%c0_20, %c0_21] : memref<104x256xbf16, #tpu.memory_space<vmem>>, vector<104x128xbf16>
    tpu.vector_store %arg8[%c0_20, %c0_21], %33 {strides = array<i32>} : memref<104x256xbf16, #tpu.memory_space<vmem>>, vector<104x128xbf16>,
    %c0_22 = arith.constant 0 : index
    %c0_23 = arith.constant 0 : index
    %35 = vector.load %arg8[%c0_22, %c0_23] : memref<104x256xbf16, #tpu.memory_space<vmem>>, vector<104x256xbf16>
    %c0_24 = arith.constant 0 : index
    %c0_25 = arith.constant 0 : index
    %36 = vector.load %arg5[%c0_24, %c0_25] : memref<256x256xbf16, #tpu.memory_space<vmem>>, vector<256x256xbf16>
    %cst_26 = arith.constant dense<0.000000e+00> : vector<104x256xf32>
    %37 = tpu.matmul %35, %36, %cst_26 {dimension_numbers = #tpu.dot_dimension_numbers<[1], [0], [0], [1], [0, 0, 1, 1], [], []>} : vector<104x256xbf16>, vector<256x256xbf16>, vector<104x256xf32> -> vector<104x256xf32>
    %c0_27 = arith.constant 0 : index
    %c0_28 = arith.constant 0 : index
    %38 = vector.load %arg6[%c0_27, %c0_28] : memref<1x256xf32, #tpu.memory_space<vmem>>, vector<1x256xf32>
    %39 = vector.broadcast %38 : vector<1x256xf32> to vector<104x256xf32>
    %40 = arith.addf %37, %39 : vector<104x256xf32>
    %41 = vector.extract_strided_slice %40 {offsets = [0, 0], sizes = [104, 128], strides = [1, 1]} : vector<104x256xf32> to vector<104x128xf32>
    %cst_29 = arith.constant 5.000000e-01 : f32
    %42 = vector.broadcast %cst_29 : f32 to vector<104x128xf32>
    %43 = arith.mulf %42, %41 : vector<104x128xf32>
    %44 = math.tanh %43 : vector<104x128xf32>
    %cst_30 = arith.constant 5.000000e-01 : f32
    %45 = vector.broadcast %cst_30 : f32 to vector<104x128xf32>
    %46 = arith.mulf %45, %44 : vector<104x128xf32>
    %cst_31 = arith.constant 5.000000e-01 : f32
    %47 = vector.broadcast %cst_31 : f32 to vector<104x128xf32>
    %48 = arith.addf %46, %47 : vector<104x128xf32>
    %49 = arith.mulf %41, %48 : vector<104x128xf32>
    %50 = vector.extract_strided_slice %40 {offsets = [0, 128], sizes = [104, 128], strides = [1, 1]} : vector<104x256xf32> to vector<104x128xf32>
    %51 = arith.mulf %49, %50 : vector<104x128xf32>
    %52 = arith.addf %0, %51 : vector<104x128xf32>
    %c0_32 = arith.constant 0 : index
    %c0_33 = arith.constant 0 : index
    %53 = vector.load %arg7[%c0_32, %c0_33] : memref<104x128xf32, #tpu.memory_space<vmem>>, vector<104x128xf32>
    tpu.vector_store %arg7[%c0_32, %c0_33], %52 {strides = array<i32>} : memref<104x128xf32, #tpu.memory_space<vmem>>, vector<104x128xf32>,
    return
  }
  func.func @transform_0(%arg0: i32) -> (i32, i32) {
    %c0_i32 = arith.constant 0 : i32
    %c0_i32_0 = arith.constant 0 : i32
    return %arg0, %c0_i32 : i32, i32
  }
  func.func @transform_1(%arg0: i32) -> (i32, i32) {
    %c0_i32 = arith.constant 0 : i32
    %c0_i32_0 = arith.constant 0 : i32
    return %arg0, %c0_i32 : i32, i32
  }
  func.func @transform_2(%arg0: i32) -> (i32, i32) {
    %c0_i32 = arith.constant 0 : i32
    %c0_i32_0 = arith.constant 0 : i32
    %c0_i32_1 = arith.constant 0 : i32
    return %c0_i32, %c0_i32_0 : i32, i32
  }
  func.func @transform_3(%arg0: i32) -> (i32, i32) {
    %c0_i32 = arith.constant 0 : i32
    %c0_i32_0 = arith.constant 0 : i32
    %c0_i32_1 = arith.constant 0 : i32
    return %c0_i32, %c0_i32_0 : i32, i32
  }
  func.func @transform_4(%arg0: i32) -> (i32, i32) {
    %c0_i32 = arith.constant 0 : i32
    %c0_i32_0 = arith.constant 0 : i32
    %c0_i32_1 = arith.constant 0 : i32
    return %c0_i32, %c0_i32_0 : i32, i32
  }
  func.func @transform_5(%arg0: i32) -> (i32, i32) {
    %c0_i32 = arith.constant 0 : i32
    %c0_i32_0 = arith.constant 0 : i32
    %c0_i32_1 = arith.constant 0 : i32
    return %c0_i32, %c0_i32_0 : i32, i32
  }
  func.func @transform_6(%arg0: i32) -> (i32, i32) {
    %c0_i32 = arith.constant 0 : i32
    %c0_i32_0 = arith.constant 0 : i32
    return %arg0, %c0_i32 : i32, i32
  }
}

</mosaic_0001>

<bundles_post_ra>
// kernel: flat_forward.1
= control target key start
LH: loop header
LB: loop body
LE: loop exit
PB: predicated region body
PF: predicated region fallthrough
CT: control target
= control target key end

     0   :  { %11 = vsyncpa [#allocation4], 0  ;;  %s3136_s0 = inlined_call_operand.hbm [shape: f32[200,128], index: 0, kind: input, shape index: {}]   ;;  %s3137_s1 = inlined_call_operand.hbm [shape: f32[200,128], index: 1, kind: input, shape index: {}]   ;;  %s3138_s2 = inlined_call_operand.hbm [shape: bf16[256,256], index: 2, kind: input, shape index: {}]   ;;  %s3139_s3 = inlined_call_operand.vmem [shape: f32[1,256], index: 3, kind: input, shape index: {}]   ;;  %s3140_s4 = inlined_call_operand.hbm [shape: bf16[256,256], index: 4, kind: input, shape index: {}]   ;;  %s3141_s5 = inlined_call_operand.vmem [shape: f32[1,256], index: 5, kind: input, shape index: {}]   ;;  %s3142_s6 = inlined_call_operand.hbm [shape: f32[200,128], index: 6, kind: output, shape index: {}]  }
   0x1   :  { %13 = vsyncpa [#allocation4 + $0x1], 0 }
   0x2   :  { %14 = vsyncpa [#allocation7], 0 }
   0x3   :  { %16 = vsyncpa [#allocation7 + $0x1], 0 }
   0x4   :  { %17 = vsyncpa [#allocation10], 0 }
   0x5   :  { %18 = vsyncpa [#allocation5], 0 }
   0x6   :  { %20 = vsyncpa [#allocation5 + $0x1], 0  ;;  %s2492_s21 = smov 0   ;;  %s2494_s22 = smov 0  }
   0x7   :  { %s2496_s23 = smov 0   ;;  %s2498_s24 = smov 0  }
   0x8 LB: > { %s2513_s25 = sadd.s32 4294967295, %s2442_s24   ;;  %s1755_s26 = sadd.s32 4294967294, %s2442_s24   ;;  %s2442_s24 = sphi %s2498_s24, %s3166_s24   ;;  %s2438_s23 = sphi %s2496_s23, %s3170_s23   ;;  %s2434_s22 = sphi %s2494_s22, %s3169_s22   ;;  %s2430_s21 = sphi %s2492_s21, %s3168_s21  }
   0x9   : > { %s2517_s27 = sadd.s32 1, %s2442_s24   ;;  %s33_s28 = sadd.s32 1, %s2438_s23 }
   0xa   : > { %3148 = sst [smem:[#allocation17_spill]] %s2517_s27  ;;  %s30_s29 = ssub.s32 %s2442_s24, %s2517_s27 }
   0xb   : > { %p40_p0 = scmp.ne.s32.totalorder %s2438_s23, %s2434_s22  ;;  %p31_p1 = scmp.eq.s32.totalorder %s30_s29, 0 }
   0xc   : > { %p41_p2 = scmp.eq.s32.totalorder %s2442_s24, 0  ;;  %p46_p3 = scmp.ne.s32.totalorder %s2434_s22, %s2430_s21 }
   0xd   : > { %p3143_p4 = scmp.eq.s32.totalorder %s2513_s25, 0  ;;  %p180_p7 = scmp.eq.s32.totalorder %s2513_s25, 1 }
   0xe   : > { %s2529_s30 = scalar_select %p31_p1, %s2438_s23, %s33_s28  }
   0xf   : > { %p2531_p5 = por %p41_p2, %p40_p0  ;;  %p2537_p6 = por %p3143_p4, %p46_p3 }
  0x10   : > { %3149 = sst [smem:[#allocation18_spill]] %s2529_s30  ;;  %p186_p8 = scmp.eq.s32.totalorder %s1755_s26, 1 }
  0x11   : > { %s3150_s7 = scalar_select %p2531_p5, 1, 0 }
  0x12   : > { %s3151_s8 = scalar_select %p2537_p6, 1, 0 }
  0x13   : > { %p1756_p9 = scmp.ge.s32.totalorder %s2442_s24, 1  ;;  %p193_p10 = scmp.lt.s32.totalorder %s2442_s24, 3 }
  0x14   : > { %p2544_p11 = por %p180_p7, %p40_p0  ;;  %p2548_p12 = por %p186_p8, %p46_p3 }
  0x15   : > { %p2552_p13 = pnand %p1756_p9, %p193_p10  ;;  %s2444_s12 = smov [#allocation8]  }
  0x16   : > { %s3152_s9 = scalar_select %p2544_p11, 1, 0 }
  0x17   : > { %s3153_s10 = scalar_select %p2548_p12, 1, 0 }
  0x18   : > { %s3154_s11 = scalar_select %p2552_p13, 1, 0 }
  0x19   : > { %p1967_p1 = pneg %p2552_p13  ;;  %s205_s13 = sshll.u32 %s2444_s12, 4  ;;  %s206_s13 = int_to_ptr.vmem [resolvable:$true] %s205_s13 }
  0x1a   : > { %s2445_s15 = smov [#allocation9]   ;;  %s2252_s19 = scalar_lea.hbm %s3138_s2, 4096 }
  0x1b   : > { %p2560_p2 = pnand %p1967_p1, %p3143_p4  ;;  %s221_s16 = sshll.u32 %s2445_s15, 4  ;;  %s2564_s16 = int_to_ptr.vmem [resolvable:$true] %s221_s16 }
  0x1c   : > { %p2253_p0 = scmp.ne.s32.totalorder %s3138_s2, %s2252_s19  ;;  %p2259_p9 = scmp.lt.u32.totalorder %s2252_s19, %s3138_s2 }
  0x1d   : > { %p2254_p3 = pneg %p2560_p2 }
  0x1f   : > { %p2255_p7 = pnand %p2254_p3, %p2253_p0 }
  0x21   : > { %p2256_p8 = pneg %p2255_p7 }
  0x23   : > { %p2261_p10 = pnand %p2259_p9, %p2256_p8 }
  0x25   : > { %2264 = shalt.err (!%p2261_p10)
}
  0x26   : > { %s2265_s12 = scalar_lea.vmem %s206_s13, 4096  ;;  %p2273_p11 = scmp.lt.s32.totalorder %s206_s13, %s206_s13 }
  0x27   : > { %p2266_p1 = scmp.ne.s32.totalorder %s206_s13, %s2265_s12  ;;  %p2274_p6 = scmp.lt.s32.totalorder %s2265_s12, %s2265_s12 }
  0x29   : > { %p2268_p4 = pnand %p2266_p1, %p2254_p3  ;;  %p2275_p13 = por %p2274_p6, %p2273_p11 }
  0x2b   : > { %p2269_p12 = pneg %p2268_p4 }
  0x2d   : > { %p2276_p5 = pnand %p2275_p13, %p2269_p12 }
  0x2f   : > { %2279 = shalt.err (!%p2276_p5)
}
  0x30   : > { %s2446_s15 = smov 128   ;;  %s2447_s17 = smov 8  }
  0x31   : > { %1970 = dma.hbm_to_vmem [thread:$0]  (!%p2560_p2), %s3138_s2, 4096, %s206_s13, [#allocation7], %s2446_s15, %s2446_s15, %s2447_s17  }
  0x32   : > { %s2280_s28 = scalar_lea.hbm %s3140_s4, 4096 }
  0x33   : > { %p2281_p4 = scmp.ne.s32.totalorder %s3140_s4, %s2280_s28  ;;  %p2287_p11 = scmp.lt.u32.totalorder %s2280_s28, %s3140_s4 }
  0x35   : > { %p2283_p5 = pnand %p2281_p4, %p2254_p3 }
  0x37   : > { %p2284_p6 = pneg %p2283_p5 }
  0x39   : > { %p2289_p12 = pnand %p2287_p11, %p2284_p6 }
  0x3b   : > { %2292 = shalt.err (!%p2289_p12)
}
  0x3c   : > { %s2293_s13 = scalar_lea.vmem %s2564_s16, 4096  ;;  %p2301_p8 = scmp.lt.s32.totalorder %s2564_s16, %s2564_s16 }
  0x3d   : > { %p2294_p13 = scmp.ne.s32.totalorder %s2564_s16, %s2293_s13  ;;  %p2302_p9 = scmp.lt.s32.totalorder %s2293_s13, %s2293_s13 }
  0x3f   : > { %p2296_p0 = pnand %p2294_p13, %p2254_p3  ;;  %p2303_p10 = por %p2302_p9, %p2301_p8 }
  0x41   : > { %p2297_p7 = pneg %p2296_p0 }
  0x43   : > { %p2304_p1 = pnand %p2303_p10, %p2297_p7 }
  0x45   : > { %2307 = shalt.err (!%p2304_p1)
}
  0x46   : > { %1973 = dma.hbm_to_vmem [thread:$0]  (!%p2560_p2), %s3140_s4, 4096, %s2564_s16, [#allocation10], %s2446_s15, %s2446_s15, %s2447_s17  }
  0x47   : > { %p1759_p4 = scmp.ge.s32.totalorder %s2442_s24, 2 }
  0x48   : > { %p3156_p3 = scmp.ne.s32.totalorder (!%p1759_p4), %s3150_s7, 0 }
  0x49   : > { %234 = sbr.rel (%p1759_p4) target bundleno = 152 (0x98), region = 32 }
  0x50   : > { %237 = sbr.rel (!%p3156_p3) target bundleno = 115 (0x73), region = 36  ;;  %s238_s18 = sand.u32 (%p3156_p3), 1, %s2438_s23  }
  0x51   : > { %s243_s19 = smul.u32 (%p3156_p3), 13, %s2442_s24  ;;  %s2623_s15 = scalar_lea.sflag (%p3156_p3), [#allocation4], %s238_s18 }
  0x52   : > { %s1953_s20 = smul.u32 (%p3156_p3), 104, %s238_s18 }
  0x53   : > { %s244_s26 = ssub.s32 (%p3156_p3), 25, %s243_s19 }
  0x54   : > { %p245_p5 = scmp.lt.s32.totalorder (%p3156_p3), %s244_s26, 13  ;;  %s242_s17 = scalar_lea.vmem (%p3156_p3), [#allocation3], %s1953_s20 }
  0x57   : > { %s3172_s26 = smov (!%p245_p5, %s244_s26), 13 }
  0x58   : > { %s2620_s14 = sshll.u32 %s3172_s26, 7 }
  0x59   : > { %s249_s16 = ssub.s32 1664, %s2620_s14 }
  0x5a   : > { %250 = vsyncadd %s2623_s15, %s249_s16  ;;  %p1761_p2 = scmp.ne.s32.totalorder %s2620_s14, 0  ;;  %s1911_s28 = smul.u32 1664, %s2442_s24 }
  0x5b   : > { %s255_s29 = sshll.u32 %s242_s17, 4  ;;  %s2312_s20 = scalar_lea.hbm %s3136_s0, 3200  ;;  %s2633_s29 = int_to_ptr.vmem [resolvable:$true] %s255_s29 }
  0x5c   : > { %s2631_s27 = scalar_lea.hbm %s3136_s0, %s1911_s28 }
  0x5d   : > { %s2308_s30 = scalar_lea.hbm %s2631_s27, %s2620_s14  ;;  %p2313_p13 = scmp.lt.u32.totalorder %s2631_s27, %s3136_s0 }
  0x5e   : > { %p2309_p6 = scmp.ne.s32.totalorder %s2631_s27, %s2308_s30  ;;  %p2314_p0 = scmp.lt.u32.totalorder %s2312_s20, %s2308_s30 }
  0x5f   : > { %p2316_p8 = scmp.lt.u32.totalorder %s2308_s30, %s2631_s27 }
  0x60   : > { %p2310_p11 = pnand %p2309_p6, %p1761_p2  ;;  %p2315_p7 = por %p2314_p0, %p2313_p13 }
  0x62   : > { %p2311_p12 = pneg %p2310_p11  ;;  %p2317_p9 = por %p2316_p8, %p2315_p7 }
  0x64   : > { %p2318_p10 = pnand %p2317_p9, %p2311_p12 }
  0x66   : > { %2321 = shalt.err (!%p2318_p10)
}
  0x67   : > { %s2322_s17 = scalar_lea.vmem %s2633_s29, %s2620_s14  ;;  %s2448_s28 = smov [#allocation3]  }
  0x68   : > { %p2323_p1 = scmp.ne.s32.totalorder %s2633_s29, %s2322_s17  ;;  %s2326_s12 = sshll.u32 %s2448_s28, 4  ;;  %s2327_s12 = int_to_ptr.vmem [resolvable:$false] %s2326_s12 }
  0x69   : > { %s2328_s13 = scalar_lea.vmem %s2327_s12, 3328  ;;  %p2329_p6 = scmp.lt.s32.totalorder %s2633_s29, %s2327_s12 }
  0x6a   : > { %p2324_p3 = pnand %p2323_p1, %p1761_p2  ;;  %p2330_p11 = scmp.lt.s32.totalorder %s2328_s13, %s2322_s17 }
  0x6c   : > { %p2325_p5 = pneg %p2324_p3  ;;  %p2331_p13 = por %p2330_p11, %p2329_p6 }
  0x6e   : > { %p2332_p0 = pnand %p2331_p13, %p2325_p5 }
  0x70   : > { %2335 = shalt.err (!%p2332_p0)
}
  0x71   : > { %s2449_s30 = smov 128   ;;  %s2450_s18 = smov 8  }
  0x72   : > { %261 = dma.hbm_to_vmem [thread:$0]  (%p1761_p2), %s2631_s27, %s2620_s14, %s2633_s29, %s2623_s15, %s2449_s30, %s2449_s30, %s2450_s18  }
  0x73 PF: > { %p3157_p12 = scmp.ne.s32.totalorder %s3150_s7, 0 }
  0x74   : > { %s265_s19 = sand.u32 (%p3157_p12), 1, %s2442_s24   ;;  %s267_s20 = sand.u32 (%p3157_p12), 1, %s2438_s23  }
  0x75   : > { %264 = sbr.rel (!%p3157_p12) target bundleno = 152 (0x98), region = 40  ;;  %s2668_s13 = scalar_lea.sflag (%p3157_p12), [#allocation7], %s265_s19 }
  0x76   : > { %s1954_s26 = smul.u32 (%p3157_p12), 104, %s267_s20 }
  0x77   : > { %s270_s16 = smul.u32 (%p3157_p12), 13, %s2442_s24 }
  0x78   : > { %s269_s14 = scalar_lea.vmem (%p3157_p12), [#allocation6], %s1954_s26 }
  0x79   : > { %s271_s17 = ssub.s32 (%p3157_p12), 25, %s270_s16 }
  0x7a   : > { %p272_p7 = scmp.lt.s32.totalorder (%p3157_p12), %s271_s17, 13 }
  0x7c   : > { %s3174_s17 = smov (!%p272_p7, %s271_s17), 13 }
  0x7d   : > { %s2665_s28 = sshll.u32 %s3174_s17, 7 }
  0x7e   : > { %s276_s12 = ssub.s32 1664, %s2665_s28 }
  0x7f   : > { %277 = vsyncadd %s2668_s13, %s276_s12  ;;  %p1766_p2 = scmp.ne.s32.totalorder %s2665_s28, 0  ;;  %s1912_s7 = smul.u32 1664, %s2442_s24 }
  0x80   : > { %s282_s15 = sshll.u32 %s269_s14, 4  ;;  %s2340_s26 = scalar_lea.hbm %s3137_s1, 3200  ;;  %s2678_s15 = int_to_ptr.vmem [resolvable:$true] %s282_s15 }
  0x81   : > { %s2676_s30 = scalar_lea.hbm %s3137_s1, %s1912_s7 }
  0x82   : > { %s2336_s18 = scalar_lea.hbm %s2676_s30, %s2665_s28  ;;  %p2341_p1 = scmp.lt.u32.totalorder %s2676_s30, %s3137_s1 }
  0x83   : > { %p2337_p8 = scmp.ne.s32.totalorder %s2676_s30, %s2336_s18  ;;  %p2342_p3 = scmp.lt.u32.totalorder %s2340_s26, %s2336_s18 }
  0x84   : > { %p2344_p6 = scmp.lt.u32.totalorder %s2336_s18, %s2676_s30 }
  0x85   : > { %p2338_p9 = pnand %p2337_p8, %p1766_p2  ;;  %p2343_p5 = por %p2342_p3, %p2341_p1 }
  0x87   : > { %p2339_p10 = pneg %p2338_p9  ;;  %p2345_p11 = por %p2344_p6, %p2343_p5 }
  0x89   : > { %p2346_p13 = pnand %p2345_p11, %p2339_p10 }
  0x8b   : > { %2349 = shalt.err (!%p2346_p13)
}
  0x8c   : > { %s2350_s12 = scalar_lea.vmem %s2678_s15, %s2665_s28  ;;  %s2451_s14 = smov [#allocation6]  }
  0x8d   : > { %p2351_p0 = scmp.ne.s32.totalorder %s2678_s15, %s2350_s12  ;;  %s2354_s7 = sshll.u32 %s2451_s14, 4  ;;  %s2355_s7 = int_to_ptr.vmem [resolvable:$false] %s2354_s7 }
  0x8e   : > { %s2356_s29 = scalar_lea.vmem %s2355_s7, 3328  ;;  %p2357_p8 = scmp.lt.s32.totalorder %s2678_s15, %s2355_s7 }
  0x8f   : > { %p2352_p12 = pnand %p2351_p0, %p1766_p2  ;;  %p2358_p9 = scmp.lt.s32.totalorder %s2356_s29, %s2350_s12 }
  0x91   : > { %p2353_p7 = pneg %p2352_p12  ;;  %p2359_p1 = por %p2358_p9, %p2357_p8 }
  0x93   : > { %p2360_p3 = pnand %p2359_p1, %p2353_p7 }
  0x95   : > { %2363 = shalt.err (!%p2360_p3)
}
  0x96   : > { %s2452_s27 = smov 128   ;;  %s2453_s18 = smov 8  }
  0x97   : > { %288 = dma.hbm_to_vmem [thread:$0]  (%p1766_p2), %s2676_s30, %s2665_s28, %s2678_s15, %s2668_s13, %s2452_s27, %s2452_s27, %s2453_s18  }
  0x98 PF: > { %p3158_p10 = scmp.ne.s32.totalorder %s3154_s11, 0 }
  0x99   : > { %s2708_s19 = sand.u32 (!%p3158_p10), 1, %s2434_s22   ;;  %p3159_p5 = scmp.ne.s32.totalorder (!%p3158_p10), %s3151_s8, 0 }
  0x9a   : > { %294 = sbr.rel (%p3158_p10) target bundleno = 819 (0x333), region = 44  ;;  %s297_s26 = scalar_lea.sflag (!%p3158_p10), [#allocation4], %s2708_s19 }
  0x9b   : > { %s2711_s20 = smul.u32 (!%p3158_p10), 104, %s2708_s19 }
  0x9d   : > { %s2715_s16 = scalar_lea.vmem (!%p3158_p10), [#allocation3], %s2711_s20 }
  0xa1   : > { %2409 = dma.done.wait (%p3159_p5), %s297_s26, 1664  }
  0xa2   : > { %2411 = vsyncadd (%p3159_p5), %s297_s26, 4294965632  ;;  %s305_s11 = sand.u32 1, %s2513_s25   ;;  %s2723_s13 = scalar_lea.vmem [#allocation6], %s2711_s20 }
  0xa3   : > { %s306_s28 = scalar_lea.sflag [#allocation7], %s305_s11 }
  0xa4   : > { %2413 = dma.done.wait (%p3159_p5), %s306_s28, 1664  }
  0xa5   : > { %2415 = vsyncadd (%p3159_p5), %s306_s28, 4294965632  ;;  %p3160_p2 = scmp.eq.s32.totalorder %s2513_s25, 0 }
  0xa7   : > { %2417 = dma.done.wait (%p3160_p2), [#allocation7], 4096   ;;  %p3161_p6 = pmov %p3160_p2 }
  0xa8   : > { %p3162_p11 = pmov %p3160_p2 }
  0xa9   : > { %2419 = vsyncadd (%p3161_p6), [#allocation7], 4294963200 }
  0xaa   : > { %2421 = dma.done.wait (%p3162_p11), [#allocation10], 4096   ;;  %p3163_p13 = pmov %p3160_p2 }
  0xab   : > { %v2025_v0 = vld [vmem:[#allocation8 + $0x4] ss:$8 sps:$4 sm:$0xff]   ;;  %v2027_v1 = vld [vmem:[#allocation8] ss:$8 sps:$4 sm:$0xff]   ;;  %v2028_v2 = vld [vmem:[#allocation8 + $0x14] ss:$8 sps:$4 sm:$0xff]  }
  0xac   : > { %2423 = vsyncadd (%p3163_p13), [#allocation10], 4294963200  ;;  %808 = vmatprep.subr.bf16.mxu0 %v2025_v0  ;;  %v2030_v3 = vld [vmem:[#allocation8 + $0x10] ss:$8 sps:$4 sm:$0xff]   ;;  %v2031_v4 = vld [vmem:[#allocation8 + $0x24] ss:$8 sps:$4 sm:$0xff]  }
  0xad   : > { %809 = vmatpush1.bf16.msra.mxu0 %v2027_v1  ;;  %v2033_v5 = vld [vmem:[#allocation8 + $0x20] ss:$8 sps:$4 sm:$0xff]   ;;  %v2034_v6 = vld [vmem:[#allocation8 + $0x34] ss:$8 sps:$4 sm:$0xff]   ;;  %v2036_v7 = vld [vmem:[#allocation8 + $0x30] ss:$8 sps:$4 sm:$0xff]  }
  0xae   : > { %810 = vmatprep.subr.bf16.mxu0 %v2028_v2  ;;  %v2037_v8 = vld [vmem:[#allocation8 + $0x44] ss:$8 sps:$4 sm:$0xff]   ;;  %v2039_v9 = vld [vmem:[#allocation8 + $0x40] ss:$8 sps:$4 sm:$0xff]   ;;  %v2040_v10 = vld [vmem:[#allocation8 + $0x54] ss:$8 sps:$4 sm:$0xff]  }
  0xaf   : > { %v2042_v11 = vld [vmem:[#allocation8 + $0x50] ss:$8 sps:$4 sm:$0xff]   ;;  %v2043_v12 = vld [vmem:[#allocation8 + $0x64] ss:$8 sps:$4 sm:$0xff]   ;;  %v2045_v13 = vld [vmem:[#allocation8 + $0x60] ss:$8 sps:$4 sm:$0xff]  }
  0xb0   : > { %v2738_v14 = vld [vmem:[%s2715_s16] sm:$0xff]  ;;  %v2741_v15 = vld [vmem:[%s2715_s16 + $0x8] sm:$0xff]  ;;  %v445_v19 = vld [vmem:[%s2723_s13] sm:$0xff]  ;;  %s3001_s12 = scalar_lea.vmem [#allocation11], %s2711_s20  ;;  %s1621_s14 = scalar_lea.sflag [#allocation5], %s2708_s19 }
  0xb1   : > { %811 = vmatpush1.bf16.msra.mxu0 %v2030_v3  ;;  %v2046_v16 = vld [vmem:[#allocation8 + $0x74] ss:$8 sps:$4 sm:$0xff]   ;;  %v1913_v17 = vpack.c.bf16 %v2738_v14, %v2738_v14  ;;  %v1914_v18 = vpack.c.bf16 %v2741_v15, %v2741_v15  ;;  %v1926_v22 = vpack.c.bf16 %v445_v19, %v445_v19  ;;  %v447_v26 = vld [vmem:[%s2723_s13 + $0x10] sm:$0xff]  ;;  %v2048_v34 = vld [vmem:[#allocation8 + $0x70] ss:$8 sps:$4 sm:$0xff]   ;;  %p3164_p0 = scmp.ne.s32.totalorder %s3152_s9, 0 }
  0xb2   : > { %812 = vmatprep.subr.bf16.mxu0 %v2031_v4  ;;  %v446_v20 = vld [vmem:[%s2723_s13 + $0x8] sm:$0xff]  ;;  %v2750_v21 = vld [vmem:[%s2715_s16 + $0x10] sm:$0xff]  ;;  %v448_v27 = vld [vmem:[%s2723_s13 + $0x18] sm:$0xff]  ;;  %v1928_v29 = vpack.c.bf16 %v447_v26, %v447_v26  ;;  %s1628_s7 = smul.u32 (%p3164_p0), 13, %s2513_s25 }
  0xb3   : > { %v1927_v23 = vpack.c.bf16 %v446_v20, %v446_v20  ;;  %v2753_v24 = vld [vmem:[%s2715_s16 + $0x18] sm:$0xff]  ;;  %v1915_v25 = vpack.c.bf16 %v2750_v21, %v2750_v21  ;;  %432 = vst [vmem:[#allocation2] sm:$0xf] %v1913_v17  ;;  %433 = vst [vmem:[#allocation2 + $0x8] sm:$0xf] %v1914_v18  ;;  %v1929_v30 = vpack.c.bf16 %v448_v27, %v448_v27  ;;  %v2762_v31 = vld [vmem:[%s2715_s16 + $0x20] sm:$0xff] }
  0xb4   : > { %v1916_v28 = vpack.c.bf16 %v2753_v24, %v2753_v24  ;;  %v2765_v32 = vld [vmem:[%s2715_s16 + $0x28] sm:$0xff]  ;;  %v449_v33 = vld [vmem:[%s2723_s13 + $0x20] sm:$0xff]  ;;  %511 = vst [vmem:[#allocation2 + $0x4] sm:$0xf] %v1926_v22  ;;  %v1917_v35 = vpack.c.bf16 %v2762_v31, %v2762_v31  ;;  %v450_v37 = vld [vmem:[%s2723_s13 + $0x28] sm:$0xff]  ;;  %s1629_s29 = ssub.s32 (%p3164_p0), 25, %s1628_s7 }
  0xb5   : > { %813 = vmatpush1.bf16.msra.mxu0 %v2033_v5  ;;  %512 = vst [vmem:[#allocation2 + $0xc] sm:$0xf] %v1927_v23  ;;  %434 = vst [vmem:[#allocation2 + $0x10] sm:$0xf] %v1915_v25  ;;  %v1918_v36 = vpack.c.bf16 %v2765_v32, %v2765_v32  ;;  %v1930_v38 = vpack.c.bf16 %v449_v33, %v449_v33  ;;  %v2774_v39 = vld [vmem:[%s2715_s16 + $0x30] sm:$0xff]  ;;  %v2777_v40 = vld [vmem:[%s2715_s16 + $0x38] sm:$0xff]  ;;  %v1931_v42 = vpack.c.bf16 %v450_v37, %v450_v37 }
  0xb6   : > { %814 = vmatprep.subr.bf16.mxu0 %v2034_v6  ;;  %v2049_v41 = vld [vmem:[#allocation8 + $0x84] ss:$8 sps:$4 sm:$0xff]   ;;  %435 = vst [vmem:[#allocation2 + $0x18] sm:$0xf] %v1916_v28  ;;  %513 = vst [vmem:[#allocation2 + $0x14] sm:$0xf] %v1928_v29  ;;  %v1919_v43 = vpack.c.bf16 %v2774_v39, %v2774_v39  ;;  %v1920_v44 = vpack.c.bf16 %v2777_v40, %v2777_v40 }
  0xb7   : > { %514 = vst [vmem:[#allocation2 + $0x1c] sm:$0xf] %v1929_v30  ;;  %v451_v45 = vld [vmem:[%s2723_s13 + $0x30] sm:$0xff]  ;;  %v452_v46 = vld [vmem:[%s2723_s13 + $0x38] sm:$0xff]  ;;  %436 = vst [vmem:[#allocation2 + $0x20] sm:$0xf] %v1917_v35 }
  0xb8   : > { %v2786_v47 = vld [vmem:[%s2715_s16 + $0x40] sm:$0xff]  ;;  %437 = vst [vmem:[#allocation2 + $0x28] sm:$0xf] %v1918_v36  ;;  %515 = vst [vmem:[#allocation2 + $0x24] sm:$0xf] %v1930_v38  ;;  %v1932_v48 = vpack.c.bf16 %v451_v45, %v451_v45  ;;  %v1933_v49 = vpack.c.bf16 %v452_v46, %v452_v46  ;;  %v2789_v50 = vld [vmem:[%s2715_s16 + $0x48] sm:$0xff] }
  0xb9   : > { %815 = vmatpush1.bf16.msra.mxu0 %v2036_v7  ;;  %v1921_v51 = vpack.c.bf16 %v2786_v47, %v2786_v47  ;;  %v453_v52 = vld [vmem:[%s2723_s13 + $0x40] sm:$0xff]  ;;  %v454_v53 = vld [vmem:[%s2723_s13 + $0x48] sm:$0xff]  ;;  %516 = vst [vmem:[#allocation2 + $0x2c] sm:$0xf] %v1931_v42  ;;  %438 = vst [vmem:[#allocation2 + $0x30] sm:$0xf] %v1919_v43  ;;  %v1922_v54 = vpack.c.bf16 %v2789_v50, %v2789_v50 }
  0xba   : > { %816 = vmatprep.subr.bf16.mxu0 %v2037_v8  ;;  %439 = vst [vmem:[#allocation2 + $0x38] sm:$0xf] %v1920_v44  ;;  %v1934_v55 = vpack.c.bf16 %v453_v52, %v453_v52  ;;  %v1935_v56 = vpack.c.bf16 %v454_v53, %v454_v53  ;;  %v2798_v57 = vld [vmem:[%s2715_s16 + $0x50] sm:$0xff]  ;;  %v2801_v58 = vld [vmem:[%s2715_s16 + $0x58] sm:$0xff]  ;;  %v455_v59 = vld [vmem:[%s2723_s13 + $0x50] sm:$0xff]  ;;  %p1630_p12 = scmp.lt.s32.totalorder (%p3164_p0), %s1629_s29, 13 }
  0xbb   : > { %v2051_v60 = vld [vmem:[#allocation8 + $0x80] ss:$8 sps:$4 sm:$0xff]   ;;  %517 = vst [vmem:[#allocation2 + $0x34] sm:$0xf] %v1932_v48  ;;  %518 = vst [vmem:[#allocation2 + $0x3c] sm:$0xf] %v1933_v49  ;;  %v1923_v61 = vpack.c.bf16 %v2798_v57, %v2798_v57  ;;  %v1924_v62 = vpack.c.bf16 %v2801_v58, %v2801_v58  ;;  %v1936_v0 = vpack.c.bf16 %v455_v59, %v455_v59 }
  0xbc   : > { %440 = vst [vmem:[#allocation2 + $0x40] sm:$0xf] %v1921_v51  ;;  %v456_v63 = vld [vmem:[%s2723_s13 + $0x58] sm:$0xff]  ;;  %v2810_v1 = vld [vmem:[%s2715_s16 + $0x60] sm:$0xff]  ;;  %v457_v2 = vld [vmem:[%s2723_s13 + $0x60] sm:$0xff] }
  0xbd   : > { %817 = vmatpush1.bf16.msra.mxu0 %v2039_v9  ;;  %441 = vst [vmem:[#allocation2 + $0x48] sm:$0xf] %v1922_v54  ;;  %519 = vst [vmem:[#allocation2 + $0x44] sm:$0xf] %v1934_v55  ;;  %v1937_v3 = vpack.c.bf16 %v456_v63, %v456_v63  ;;  %v1925_v4 = vpack.c.bf16 %v2810_v1, %v2810_v1  ;;  %v1938_v5 = vpack.c.bf16 %v457_v2, %v457_v2  ;;  %v2093_v6 = vld [vmem:[#allocation9 + $0x4] ss:$8 sps:$4 sm:$0xff]  }
  0xbe   : > { %818 = vmatprep.subr.bf16.mxu0 %v2040_v10  ;;  %520 = vst [vmem:[#allocation2 + $0x4c] sm:$0xf] %v1935_v56  ;;  %v2052_v7 = vld [vmem:[#allocation8 + $0x94] ss:$8 sps:$4 sm:$0xff]   ;;  %442 = vst [vmem:[#allocation2 + $0x50] sm:$0xf] %v1923_v61  ;;  %1415 = vmatprep.subr.bf16.mxu1 %v2093_v6 }
  0xbf   : > { %443 = vst [vmem:[#allocation2 + $0x58] sm:$0xf] %v1924_v62  ;;  %521 = vst [vmem:[#allocation2 + $0x54] sm:$0xf] %v1936_v0  ;;  %v2095_v8 = vld [vmem:[#allocation9] ss:$8 sps:$4 sm:$0xff]  }
  0xc0   : > { %v2073_v9 = vld [vmem:[#allocation2 + $0x4] ss:$8 sps:$4 sm:$0xff]   ;;  %522 = vst [vmem:[#allocation2 + $0x5c] sm:$0xf] %v1937_v3  ;;  %444 = vst [vmem:[#allocation2 + $0x60] sm:$0xf] %v1925_v4  ;;  %1416 = vmatpush1.bf16.msra.mxu1 %v2095_v8 }
  0xc1   : > { %819 = vmatpush1.bf16.msra.mxu0 %v2042_v11  ;;  %523 = vst [vmem:[#allocation2 + $0x64] sm:$0xf] %v1938_v5  ;;  %840 = vmatprep.mubr.bf16.mxu0 %v2073_v9  ;;  %v2054_v10 = vld [vmem:[#allocation8 + $0x90] ss:$8 sps:$4 sm:$0xff]   ;;  %v2055_v11 = vld [vmem:[#allocation8 + $0xa4] ss:$8 sps:$4 sm:$0xff]  }
  0xc2   : > { %820 = vmatprep.subr.bf16.mxu0 %v2043_v12  ;;  %v2057_v12 = vld [vmem:[#allocation8 + $0xa0] ss:$8 sps:$4 sm:$0xff]   ;;  %v2061_v17 = vld [vmem:[#allocation8 + $0xc4] ss:$8 sps:$4 sm:$0xff]   ;;  %v2064_v19 = vld [vmem:[#allocation8 + $0xd4] ss:$8 sps:$4 sm:$0xff]  }
  0xc3   : > { %v2063_v18 = vld [vmem:[#allocation8 + $0xc0] ss:$8 sps:$4 sm:$0xff]   ;;  %v2066_v20 = vld [vmem:[#allocation8 + $0xd0] ss:$8 sps:$4 sm:$0xff]   ;;  %v2067_v22 = vld [vmem:[#allocation8 + $0xe4] ss:$8 sps:$4 sm:$0xff]  }
  0xc4   : > { %v2069_v23 = vld [vmem:[#allocation8 + $0xe0] ss:$8 sps:$4 sm:$0xff]   ;;  %v2070_v25 = vld [vmem:[#allocation8 + $0xf4] ss:$8 sps:$4 sm:$0xff]   ;;  %v2072_v26 = vld [vmem:[#allocation8 + $0xf0] ss:$8 sps:$4 sm:$0xff]  }
  0xc5   : > { %821 = vmatpush1.bf16.msra.mxu0 %v2045_v13  ;;  %v2058_v13 = vld [vmem:[#allocation8 + $0xb4] ss:$8 sps:$4 sm:$0xff]   ;;  %v2075_v27 = vld [vmem:[#allocation2] ss:$8 sps:$4 sm:$0xff]   ;;  %v2078_v29 = vld [vmem:[#allocation2 + $0x10] ss:$8 sps:$4 sm:$0xff]  }
  0xc6   : > { %822 = vmatprep.subr.bf16.mxu0 %v2046_v16  ;;  %v2060_v16 = vld [vmem:[#allocation8 + $0xb0] ss:$8 sps:$4 sm:$0xff]   ;;  %v2076_v28 = vld [vmem:[#allocation2 + $0x14] ss:$8 sps:$4 sm:$0xff]   ;;  %v2079_v30 = vld [vmem:[#allocation2 + $0x24] ss:$8 sps:$4 sm:$0xff]  }
  0xc7   : > { %v2081_v33 = vld [vmem:[#allocation2 + $0x20] ss:$8 sps:$4 sm:$0xff]   ;;  %v2084_v35 = vld [vmem:[#allocation2 + $0x30] ss:$8 sps:$4 sm:$0xff]   ;;  %v2085_v36 = vld [vmem:[#allocation2 + $0x44] ss:$8 sps:$4 sm:$0xff]  }
  0xc8   : > { %v2087_v37 = vld [vmem:[#allocation2 + $0x40] ss:$8 sps:$4 sm:$0xff]   ;;  %v2088_v38 = vld [vmem:[#allocation2 + $0x54] ss:$8 sps:$4 sm:$0xff]   ;;  %v2090_v42 = vld [vmem:[#allocation2 + $0x50] ss:$8 sps:$4 sm:$0xff]  }
  0xc9   : > { %823 = vmatpush1.bf16.msra.mxu0 %v2048_v34  ;;  %v2082_v34 = vld [vmem:[#allocation2 + $0x34] ss:$8 sps:$4 sm:$0xff]   ;;  %v2098_v46 = vld [vmem:[#allocation9 + $0x10] ss:$8 sps:$4 sm:$0xff]   ;;  %v2101_v49 = vld [vmem:[#allocation9 + $0x20] ss:$8 sps:$4 sm:$0xff]  }
  0xca   : > { %824 = vmatprep.subr.bf16.mxu0 %v2049_v41  ;;  %v536_v41 = vld [vmem:[#allocation2 + $0x60] sm:$0xff]  ;;  %v2099_v48 = vld [vmem:[#allocation9 + $0x24] ss:$8 sps:$4 sm:$0xff]   ;;  %v2107_v54 = vld [vmem:[#allocation9 + $0x40] ss:$8 sps:$4 sm:$0xff]  }
  0xcb   : > { %v1812_v43 = vcombine.high %v536_v41, %v536_v41  ;;  %v1811_v44 = vcombine.low %v536_v41, %v536_v41  ;;  %v2096_v45 = vld [vmem:[#allocation9 + $0x14] ss:$8 sps:$4 sm:$0xff]   ;;  %v2104_v52 = vld [vmem:[#allocation9 + $0x30] ss:$8 sps:$4 sm:$0xff]   ;;  %v2105_v53 = vld [vmem:[#allocation9 + $0x44] ss:$8 sps:$4 sm:$0xff]  }
  0xcc   : > { %1417 = vmatprep.subr.bf16.mxu1 %v2096_v45  ;;  %v2102_v51 = vld [vmem:[#allocation9 + $0x34] ss:$8 sps:$4 sm:$0xff]   ;;  %v2110_v56 = vld [vmem:[#allocation9 + $0x50] ss:$8 sps:$4 sm:$0xff]   ;;  %v2111_v59 = vld [vmem:[#allocation9 + $0x64] ss:$8 sps:$4 sm:$0xff]  }
  0xcd   : > { %825 = vmatpush1.bf16.msra.mxu0 %v2051_v60  ;;  %1418 = vmatpush1.bf16.msra.mxu1 %v2098_v46  ;;  %v2108_v55 = vld [vmem:[#allocation9 + $0x54] ss:$8 sps:$4 sm:$0xff]   ;;  %v2113_v60 = vld [vmem:[#allocation9 + $0x60] ss:$8 sps:$4 sm:$0xff]   ;;  %v2116_v62 = vld [vmem:[#allocation9 + $0x70] ss:$8 sps:$4 sm:$0xff]  }
  0xce   : > { %826 = vmatprep.subr.bf16.mxu0 %v2052_v7  ;;  %1419 = vmatprep.subr.bf16.mxu1 %v2099_v48  ;;  %v2114_v61 = vld [vmem:[#allocation9 + $0x74] ss:$8 sps:$4 sm:$0xff]   ;;  %v2117_v63 = vld [vmem:[#allocation9 + $0x84] ss:$8 sps:$4 sm:$0xff]   ;;  %v2119_v0 = vld [vmem:[#allocation9 + $0x80] ss:$8 sps:$4 sm:$0xff]  }
  0xcf   : > { %v2120_v2 = vld [vmem:[#allocation9 + $0x94] ss:$8 sps:$4 sm:$0xff]   ;;  %v2122_v3 = vld [vmem:[#allocation9 + $0x90] ss:$8 sps:$4 sm:$0xff]   ;;  %v2123_v4 = vld [vmem:[#allocation9 + $0xa4] ss:$8 sps:$4 sm:$0xff]  }
  0xd0   : > { %v2125_v5 = vld [vmem:[#allocation9 + $0xa0] ss:$8 sps:$4 sm:$0xff]   ;;  %v2126_v6 = vld [vmem:[#allocation9 + $0xb4] ss:$8 sps:$4 sm:$0xff]   ;;  %v2128_v7 = vld [vmem:[#allocation9 + $0xb0] ss:$8 sps:$4 sm:$0xff]  }
  0xd1   : > { %827 = vmatpush1.bf16.msra.mxu0 %v2054_v10  ;;  %1420 = vmatpush1.bf16.msra.mxu1 %v2101_v49  ;;  %v2129_v8 = vld [vmem:[#allocation9 + $0xc4] ss:$8 sps:$4 sm:$0xff]   ;;  %v2131_v9 = vld [vmem:[#allocation9 + $0xc0] ss:$8 sps:$4 sm:$0xff]   ;;  %v2132_v10 = vld [vmem:[#allocation9 + $0xd4] ss:$8 sps:$4 sm:$0xff]  }
  0xd2   : > { %828 = vmatprep.subr.bf16.mxu0 %v2055_v11  ;;  %1421 = vmatprep.subr.bf16.mxu1 %v2102_v51  ;;  %v2134_v11 = vld [vmem:[#allocation9 + $0xd0] ss:$8 sps:$4 sm:$0xff]  }
  0xd5   : > { %829 = vmatpush1.bf16.msra.mxu0 %v2057_v12  ;;  %1422 = vmatpush1.bf16.msra.mxu1 %v2104_v52  ;;  %v2135_v12 = vld [vmem:[#allocation9 + $0xe4] ss:$8 sps:$4 sm:$0xff]  }
  0xd6   : > { %830 = vmatprep.subr.bf16.mxu0 %v2058_v13  ;;  %1423 = vmatprep.subr.bf16.mxu1 %v2105_v53  ;;  %v2137_v13 = vld [vmem:[#allocation9 + $0xe0] ss:$8 sps:$4 sm:$0xff]  }
  0xd9   : > { %831 = vmatpush1.bf16.msra.mxu0 %v2060_v16  ;;  %1424 = vmatpush1.bf16.msra.mxu1 %v2107_v54  ;;  %v2138_v16 = vld [vmem:[#allocation9 + $0xf4] ss:$8 sps:$4 sm:$0xff]  }
  0xda   : > { %832 = vmatprep.subr.bf16.mxu0 %v2061_v17  ;;  %1425 = vmatprep.subr.bf16.mxu1 %v2108_v55  ;;  %v2140_v17 = vld [vmem:[#allocation9 + $0xf0] ss:$8 sps:$4 sm:$0xff]  }
  0xdd   : > { %833 = vmatpush1.bf16.msra.mxu0 %v2063_v18  ;;  %1426 = vmatpush1.bf16.msra.mxu1 %v2110_v56  ;;  %v571_v18 = vlaneseq }
  0xde   : > { %834 = vmatprep.subr.bf16.mxu0 %v2064_v19  ;;  %1427 = vmatprep.subr.bf16.mxu1 %v2111_v59 }
  0xdf   : > { %v2815_v19 = vshrl.u32 %v571_v18, 7 }
  0xe1   : > { %835 = vmatpush1.bf16.msra.mxu0 %v2066_v20  ;;  %1428 = vmatpush1.bf16.msra.mxu1 %v2113_v60  ;;  %v573_v20 = vsub.s32 0, %v2815_v19 }
  0xe2   : > { %836 = vmatprep.subr.bf16.mxu0 %v2067_v22  ;;  %1429 = vmatprep.subr.bf16.mxu1 %v2114_v61  ;;  %v569_v22 = vld [vmem:[%s3139_s3] sm:$0x3] }
  0xe5   : > { %837 = vmatpush1.bf16.msra.mxu0 %v2069_v23  ;;  %1430 = vmatpush1.bf16.msra.mxu1 %v2116_v62  ;;  %v2823_v23 = vrot.slane %v569_v22, %v573_v20 }
  0xe6   : > { %838 = vmatprep.subr.bf16.mxu0 %v2070_v25  ;;  %1431 = vmatprep.subr.bf16.mxu1 %v2117_v63 }
  0xe9   : > { %839 = vmatpush1.bf16.msra.mxu0 %v2072_v26  ;;  %1432 = vmatpush1.bf16.msra.mxu1 %v2119_v0 }
  0xea   : > { %1433 = vmatprep.subr.bf16.mxu1 %v2120_v2 }
  0xec   : > { %841 = vmatmul.mubr.bf16.vlgmr.msra.gmra.mrb[0].mxu0 %v2075_v27 }
  0xed   : > { %850 = vmatprep.mubr.bf16.mxu0 %v2076_v28  ;;  %1434 = vmatpush1.bf16.msra.mxu1 %v2122_v3 }
  0xee   : > { %1435 = vmatprep.subr.bf16.mxu1 %v2123_v4 }
  0xf1   : > { %1436 = vmatpush1.bf16.msra.mxu1 %v2125_v5 }
  0xf2   : > { %1437 = vmatprep.subr.bf16.mxu1 %v2126_v6 }
  0xf4   : > { %851 = vmatmul.mubr.bf16.gmra.mrb[4].mxu0 %v2078_v29 }
  0xf5   : > { %860 = vmatprep.mubr.bf16.mxu0 %v2079_v30  ;;  %1438 = vmatpush1.bf16.msra.mxu1 %v2128_v7 }
  0xf6   : > { %1439 = vmatprep.subr.bf16.mxu1 %v2129_v8 }
  0xf9   : > { %1440 = vmatpush1.bf16.msra.mxu1 %v2131_v9 }
  0xfa   : > { %1441 = vmatprep.subr.bf16.mxu1 %v2132_v10 }
  0xfc   : > { %861 = vmatmul.mubr.bf16.gmra.mrb[8].mxu0 %v2081_v33 }
  0xfd   : > { %870 = vmatprep.mubr.bf16.mxu0 %v2082_v34  ;;  %1442 = vmatpush1.bf16.msra.mxu1 %v2134_v11 }
  0xfe   : > { %1443 = vmatprep.subr.bf16.mxu1 %v2135_v12 }
 0x101   : > { %1444 = vmatpush1.bf16.msra.mxu1 %v2137_v13 }
 0x102   : > { %1445 = vmatprep.subr.bf16.mxu1 %v2138_v16 }
 0x104   : > { %871 = vmatmul.mubr.bf16.gmra.mrb[12].mxu0 %v2084_v35 }
 0x105   : > { %880 = vmatprep.mubr.bf16.mxu0 %v2085_v36  ;;  %1446 = vmatpush1.bf16.msra.mxu1 %v2140_v17 }
 0x10c   : > { %881 = vmatmul.mubr.bf16.gmra.mrb[16].mxu0 %v2087_v37 }
 0x10d   : > { %890 = vmatprep.mubr.bf16.mxu0 %v2088_v38 }
 0x114   : > { %891 = vmatmul.mubr.bf16.gmra.mrb[20].mxu0 %v2090_v42 }
 0x115   : > { %900 = vmatprep.mubr.bf16.mxu0 %v1812_v43 }
 0x11c   : > { %901 = vmatmul.mubr.bf16.gmra.mrb[24].mxu0 %v1811_v44  ;;  %v577_v44 = vsub.s32 1, %v2815_v19 }
 0x11e   : > { %v2832_v49 = vrot.slane %v569_v22, %v577_v44 }
 0x1bf   : > { %v842_v25 = vpop.f32.mrb[0].mxu0 }
 0x1c0   : > { %v843_v26 = vadd.f32 %v842_v25, %v2823_v23  ;;  %v844_v27 = vpop.f32.mrb[1].mxu0 }
 0x1c1   : > { %v846_v28 = vpop.f32.mrb[2].mxu0  ;;  %v845_v0 = vadd.f32 %v844_v27, %v2832_v49 }
 0x1c2   : > { %v909_v29 = vmul.f32 0.5, %v843_v26  ;;  %v847_v30 = vadd.f32 %v846_v28, %v2823_v23  ;;  %v848_v33 = vpop.f32.mrb[3].mxu0 }
 0x1c3   : > { %v849_v6 = vadd.f32 %v848_v33, %v2832_v49 }
 0x1c4   : > { %2161 = vtanh.f32 %v909_v29  ;;  %v910_v34 = vmul.f32 0.5, %v847_v30 }
 0x1c6   : > { %2163 = vtanh.f32 %v910_v34 }
 0x1c7   : > { %v852_v35 = vpop.f32.mrb[4].mxu0 }
 0x1c8   : > { %v853_v36 = vadd.f32 %v852_v35, %v2823_v23  ;;  %v854_v37 = vpop.f32.mrb[5].mxu0 }
 0x1c9   : > { %v856_v38 = vpop.f32.mrb[6].mxu0 }
 0x1ca   : > { %v911_v41 = vmul.f32 0.5, %v853_v36  ;;  %v857_v42 = vadd.f32 %v856_v38, %v2823_v23  ;;  %v858_v43 = vpop.f32.mrb[7].mxu0 }
 0x1cc   : > { %2165 = vtanh.f32 %v911_v41  ;;  %v912_v45 = vmul.f32 0.5, %v857_v42  ;;  %v859_v41 = vadd.f32 %v858_v43, %v2832_v49 }
 0x1ce   : > { %v2162_v46 = vpop.eup %2161  ;;  %2167 = vtanh.f32 %v912_v45 }
 0x1cf   : > { %v935_v48 = vmul.f32 0.5, %v2162_v46  ;;  %v862_v51 = vpop.f32.mrb[8].mxu0 }
 0x1d0   : > { %v2164_v52 = vpop.eup %2163  ;;  %v863_v53 = vadd.f32 %v862_v51, %v2823_v23  ;;  %v864_v54 = vpop.f32.mrb[9].mxu0 }
 0x1d1   : > { %v948_v55 = vadd.f32 0.5, %v935_v48  ;;  %v936_v56 = vmul.f32 0.5, %v2164_v52  ;;  %v866_v59 = vpop.f32.mrb[10].mxu0 }
 0x1d2   : > { %v913_v60 = vmul.f32 0.5, %v863_v53  ;;  %v2836_v61 = vadd.f32 %v866_v59, %v2823_v23  ;;  %v2838_v62 = vpop.f32.mrb[11].mxu0 }
 0x1d3   : > { %v961_v63 = vmul.f32 %v948_v55, %v843_v26  ;;  %v949_v2 = vadd.f32 0.5, %v936_v56 }
 0x1d4   : > { %2169 = vtanh.f32 %v913_v60  ;;  %v914_v3 = vmul.f32 0.5, %v2836_v61 }
 0x1d5   : > { %v2842_v4 = vmul.f32 %v961_v63, %v845_v0  ;;  %v962_v5 = vmul.f32 %v949_v2, %v847_v30  ;;  %v855_v30 = vadd.f32 %v854_v37, %v2832_v49 }
 0x1d6   : > { %v2166_v7 = vpop.eup %2165  ;;  %2171 = vtanh.f32 %v914_v3 }
 0x1d7   : > { %v987_v8 = vmul.f32 0.5, %v2842_v4  ;;  %v2846_v9 = vmul.f32 %v962_v5, %v849_v6  ;;  %v937_v10 = vmul.f32 0.5, %v2166_v7  ;;  %v872_v11 = vpop.f32.mrb[12].mxu0  ;;  %v865_v5 = vadd.f32 %v864_v54, %v2832_v49 }
 0x1d8   : > { %v2168_v12 = vpop.eup %2167  ;;  %v2849_v13 = vadd.f32 %v872_v11, %v2823_v23  ;;  %v2851_v16 = vpop.f32.mrb[13].mxu0 }
 0x1d9   : > { %2173 = vtanh.f32 %v987_v8  ;;  %v988_v17 = vmul.f32 0.5, %v2846_v9  ;;  %v950_v18 = vadd.f32 0.5, %v937_v10  ;;  %v938_v22 = vmul.f32 0.5, %v2168_v12  ;;  %v876_v25 = vpop.f32.mrb[14].mxu0 }
 0x1da   : > { %v915_v26 = vmul.f32 0.5, %v2849_v13  ;;  %v2856_v27 = vadd.f32 %v876_v25, %v2823_v23  ;;  %v2858_v28 = vpop.f32.mrb[15].mxu0 }
 0x1db   : > { %2175 = vtanh.f32 %v988_v17  ;;  %v963_v29 = vmul.f32 %v950_v18, %v853_v36  ;;  %v951_v33 = vadd.f32 0.5, %v938_v22  ;;  %v869_v17 = vadd.f32 %v2838_v62, %v2832_v49 }
 0x1dc   : > { %2177 = vtanh.f32 %v915_v26  ;;  %v916_v34 = vmul.f32 0.5, %v2856_v27 }
 0x1dd   : > { %v2862_v35 = vmul.f32 %v963_v29, %v855_v30  ;;  %v964_v38 = vmul.f32 %v951_v33, %v857_v42 }
 0x1de   : > { %v2170_v45 = vpop.eup %2169  ;;  %2179 = vtanh.f32 %v916_v34 }
 0x1df   : > { %v989_v46 = vmul.f32 0.5, %v2862_v35  ;;  %v2866_v48 = vmul.f32 %v964_v38, %v859_v41  ;;  %v939_v51 = vmul.f32 0.5, %v2170_v45  ;;  %v882_v52 = vpop.f32.mrb[16].mxu0 }
 0x1e0   : > { %v2172_v36 = vpop.eup %2171  ;;  %v2869_v37 = vadd.f32 %v882_v52, %v2823_v23  ;;  %v2871_v55 = vpop.f32.mrb[17].mxu0 }
 0x1e1   : > { %2181 = vtanh.f32 %v989_v46  ;;  %v990_v56 = vmul.f32 0.5, %v2866_v48  ;;  %v952_v42 = vadd.f32 0.5, %v939_v51  ;;  %v940_v59 = vmul.f32 0.5, %v2172_v36  ;;  %v886_v43 = vpop.f32.mrb[18].mxu0 }
 0x1e2   : > { %v917_v60 = vmul.f32 0.5, %v2869_v37  ;;  %v2876_v63 = vadd.f32 %v886_v43, %v2823_v23  ;;  %v2878_v0 = vpop.f32.mrb[19].mxu0  ;;  %v875_v36 = vadd.f32 %v2851_v16, %v2832_v49 }
 0x1e3   : > { %v2174_v2 = vpop.eup %2173  ;;  %2183 = vtanh.f32 %v990_v56  ;;  %v965_v3 = vmul.f32 %v952_v42, %v863_v53  ;;  %v953_v6 = vadd.f32 0.5, %v940_v59 }
 0x1e4   : > { %v1013_v7 = vmul.f32 0.5, %v2174_v2  ;;  %2185 = vtanh.f32 %v917_v60  ;;  %v918_v8 = vmul.f32 0.5, %v2876_v63 }
 0x1e5   : > { %v2176_v10 = vpop.eup %2175  ;;  %v2882_v11 = vmul.f32 %v965_v3, %v865_v5  ;;  %v966_v12 = vmul.f32 %v953_v6, %v2836_v61  ;;  %v879_v6 = vadd.f32 %v2858_v28, %v2832_v49 }
 0x1e6   : > { %v2178_v18 = vpop.eup %2177  ;;  %v1026_v22 = vadd.f32 0.5, %v1013_v7  ;;  %v1014_v25 = vmul.f32 0.5, %v2176_v10  ;;  %2187 = vtanh.f32 %v918_v8 }
 0x1e7   : > { %v991_v53 = vmul.f32 0.5, %v2882_v11  ;;  %v2888_v54 = vmul.f32 %v966_v12, %v869_v17  ;;  %v941_v26 = vmul.f32 0.5, %v2178_v18  ;;  %v892_v29 = vpop.f32.mrb[20].mxu0 }
 0x1e8   : > { %v2180_v30 = vpop.eup %2179  ;;  %v1039_v33 = vmul.f32 %v1026_v22, %v2842_v4  ;;  %v1027_v34 = vadd.f32 0.5, %v1014_v25  ;;  %v2892_v38 = vadd.f32 %v892_v29, %v2823_v23  ;;  %v2894_v61 = vpop.f32.mrb[21].mxu0 }
 0x1e9   : > { %2189 = vtanh.f32 %v991_v53  ;;  %v992_v62 = vmul.f32 0.5, %v2888_v54  ;;  %v954_v41 = vadd.f32 0.5, %v941_v26  ;;  %v942_v45 = vmul.f32 0.5, %v2180_v30  ;;  %v896_v46 = vpop.f32.mrb[22].mxu0 }
 0x1ea   : > { %v1052_v51 = vadd.f32 %v1039_v33, %v2738_v14  ;;  %v1040_v52 = vmul.f32 %v1027_v34, %v2846_v9  ;;  %v919_v4 = vmul.f32 0.5, %v2892_v38  ;;  %v2902_v56 = vpop.f32.mrb[23].mxu0  ;;  %v2906_v60 = vadd.f32 %v896_v46, %v2823_v23 }
 0x1eb   : > { %v2182_v42 = vpop.eup %2181  ;;  %2191 = vtanh.f32 %v992_v62  ;;  %v967_v59 = vmul.f32 %v954_v41, %v2849_v13  ;;  %v955_v43 = vadd.f32 0.5, %v942_v45 }
 0x1ec   : > { %v1939_v2 = vpack.c.bf16 %v1052_v51, %v1052_v51  ;;  %v1053_v14 = vadd.f32 %v1040_v52, %v2741_v15  ;;  %v1015_v3 = vmul.f32 0.5, %v2182_v42  ;;  %2193 = vtanh.f32 %v919_v4 }
 0x1ed   : > { %v2184_v9 = vpop.eup %2183  ;;  %v2909_v5 = vmul.f32 %v967_v59, %v875_v36  ;;  %v968_v16 = vmul.f32 %v955_v43, %v2856_v27  ;;  %v920_v7 = vmul.f32 0.5, %v2906_v60  ;;  %v885_v51 = vadd.f32 %v2871_v55, %v2832_v49 }
 0x1ee   : > { %v2186_v13 = vpop.eup %2185  ;;  %1118 = vst [vmem:[#allocation2] sm:$0xf] %v1939_v2  ;;  %v1940_v8 = vpack.c.bf16 %v1053_v14, %v1053_v14  ;;  %v1028_v10 = vadd.f32 0.5, %v1015_v3  ;;  %v1016_v12 = vmul.f32 0.5, %v2184_v9  ;;  %v889_v43 = vadd.f32 %v2878_v0, %v2832_v49 }
 0x1ef   : > { %v993_v17 = vmul.f32 0.5, %v2909_v5  ;;  %v2916_v15 = vmul.f32 %v968_v16, %v879_v6  ;;  %v943_v18 = vmul.f32 0.5, %v2186_v13  ;;  %2195 = vtanh.f32 %v920_v7  ;;  %v902_v22 = vpop.f32.mrb[24].mxu0  ;;  %v2143_v13 = vld [vmem:[#allocation2 + $0x4] ss:$8 sps:$4 sm:$0xff]  }
 0x1f0   : > { %v2188_v25 = vpop.eup %2187  ;;  %1119 = vst [vmem:[#allocation2 + $0x8] sm:$0xf] %v1940_v8  ;;  %v1041_v27 = vmul.f32 %v1028_v10, %v2862_v35  ;;  %v1029_v53 = vadd.f32 0.5, %v1016_v12  ;;  %v2920_v28 = vadd.f32 %v902_v22, %v2823_v23  ;;  %v2922_v26 = vpop.f32.mrb[25].mxu0  ;;  %1447 = vmatprep.mubr.bf16.mxu1 %v2143_v13 }
 0x1f1   : > { %2197 = vtanh.f32 %v993_v17  ;;  %v994_v29 = vmul.f32 0.5, %v2916_v15  ;;  %v956_v30 = vadd.f32 0.5, %v943_v18  ;;  %v944_v33 = vmul.f32 0.5, %v2188_v25  ;;  %v906_v34 = vpop.f32.mrb[26].mxu0 }
 0x1f2   : > { %v1054_v62 = vadd.f32 %v1041_v27, %v2750_v21  ;;  %v1042_v41 = vmul.f32 %v1029_v53, %v2866_v48  ;;  %v921_v45 = vmul.f32 0.5, %v2920_v28  ;;  %v907_v46 = vpop.f32.mrb[27].mxu0 }
 0x1f3   : > { %v2190_v35 = vpop.eup %2189  ;;  %2199 = vtanh.f32 %v994_v29  ;;  %v969_v23 = vmul.f32 %v956_v30, %v2869_v37  ;;  %v957_v52 = vadd.f32 0.5, %v944_v33  ;;  %v2144_v46 = vld [vmem:[#allocation2 + $0x14] ss:$8 sps:$4 sm:$0xff]  }
 0x1f4   : > { %v1941_v36 = vpack.c.bf16 %v1054_v62, %v1054_v62  ;;  %v1055_v4 = vadd.f32 %v1042_v41, %v2753_v24  ;;  %v1017_v42 = vmul.f32 0.5, %v2190_v35  ;;  %2201 = vtanh.f32 %v921_v45 }
 0x1f5   : > { %v2192_v59 = vpop.eup %2191  ;;  %v2932_v21 = vmul.f32 %v969_v23, %v885_v51  ;;  %v970_v48 = vmul.f32 %v957_v52, %v2876_v63 }
 0x1f6   : > { %v2194_v2 = vpop.eup %2193  ;;  %1120 = vst [vmem:[#allocation2 + $0x10] sm:$0xf] %v1941_v36  ;;  %v1942_v37 = vpack.c.bf16 %v1055_v4, %v1055_v4  ;;  %v1030_v14 = vadd.f32 0.5, %v1017_v42  ;;  %v1018_v3 = vmul.f32 0.5, %v2192_v59  ;;  %v905_v59 = vadd.f32 %v2922_v26, %v2832_v49 }
 0x1f7   : > { %v995_v55 = vmul.f32 0.5, %v2932_v21  ;;  %v2938_v9 = vmul.f32 %v970_v48, %v889_v43  ;;  %v945_v24 = vmul.f32 0.5, %v2194_v2  ;;  %v2141_v16 = vld [vmem:[#allocation2] ss:$8 sps:$4 sm:$0xff]  }
 0x1f8   : > { %1121 = vst [vmem:[#allocation2 + $0x18] sm:$0xf] %v1942_v37  ;;  %v1043_v6 = vmul.f32 %v1030_v14, %v2882_v11  ;;  %v1031_v7 = vadd.f32 0.5, %v1018_v3  ;;  %v895_v11 = vadd.f32 %v2894_v61, %v2832_v49  ;;  %1448 = vmatmul.mubr.bf16.vlgmr.msra.gmra.mrb[0].mxu1 %v2141_v16 }
 0x1f9   : > { %v2196_v63 = vpop.eup %2195  ;;  %2203 = vtanh.f32 %v995_v55  ;;  %v996_v0 = vmul.f32 0.5, %v2938_v9  ;;  %v958_v8 = vadd.f32 0.5, %v945_v24  ;;  %1457 = vmatprep.mubr.bf16.mxu1 %v2144_v46  ;;  %v2147_v55 = vld [vmem:[#allocation2 + $0x24] ss:$8 sps:$4 sm:$0xff]  }
 0x1fa   : > { %v1056_v10 = vadd.f32 %v1043_v6, %v2762_v31  ;;  %v1044_v12 = vmul.f32 %v1031_v7, %v2888_v54  ;;  %v946_v17 = vmul.f32 0.5, %v2196_v63  ;;  %v899_v31 = vadd.f32 %v2902_v56, %v2832_v49 }
 0x1fb   : > { %v2198_v18 = vpop.eup %2197  ;;  %2205 = vtanh.f32 %v996_v0  ;;  %v971_v22 = vmul.f32 %v958_v8, %v2892_v38 }
 0x1fc   : > { %v1943_v25 = vpack.c.bf16 %v1056_v10, %v1056_v10  ;;  %v1057_v27 = vadd.f32 %v1044_v12, %v2765_v32  ;;  %v1019_v53 = vmul.f32 0.5, %v2198_v18  ;;  %v959_v29 = vadd.f32 0.5, %v946_v17  ;;  %v2150_v12 = vld [vmem:[#allocation2 + $0x34] ss:$8 sps:$4 sm:$0xff]  }
 0x1fd   : > { %v2200_v30 = vpop.eup %2199  ;;  %v984_v33 = vmul.f32 %v971_v22, %v895_v11 }
 0x1fe   : > { %v2202_v54 = vpop.eup %2201  ;;  %1122 = vst [vmem:[#allocation2 + $0x20] sm:$0xf] %v1943_v25  ;;  %v1944_v34 = vpack.c.bf16 %v1057_v27, %v1057_v27  ;;  %v1032_v62 = vadd.f32 0.5, %v1019_v53  ;;  %v1020_v41 = vmul.f32 0.5, %v2200_v30  ;;  %v972_v38 = vmul.f32 %v959_v29, %v2906_v60  ;;  %v2153_v29 = vld [vmem:[#allocation2 + $0x44] ss:$8 sps:$4 sm:$0xff]  }
 0x1ff   : > { %v997_v45 = vmul.f32 0.5, %v984_v33  ;;  %v947_v61 = vmul.f32 0.5, %v2202_v54  ;;  %v2146_v51 = vld [vmem:[#allocation2 + $0x10] ss:$8 sps:$4 sm:$0xff]  }
 0x200   : > { %1123 = vst [vmem:[#allocation2 + $0x28] sm:$0xf] %v1944_v34  ;;  %v1045_v32 = vmul.f32 %v1032_v62, %v2909_v5  ;;  %v1033_v35 = vadd.f32 0.5, %v1020_v41  ;;  %v985_v23 = vmul.f32 %v972_v38, %v899_v31  ;;  %1458 = vmatmul.mubr.bf16.gmra.mrb[4].mxu1 %v2146_v51  ;;  %v1176_v38 = vld [vmem:[%s3141_s5] sm:$0x3] }
 0x201   : > { %2207 = vtanh.f32 %v997_v45  ;;  %v960_v52 = vadd.f32 0.5, %v947_v61  ;;  %1467 = vmatprep.mubr.bf16.mxu1 %v2147_v55  ;;  %v2970_v45 = vrot.slane %v1176_v38, %v573_v20 }
 0x202   : > { %v1058_v56 = vadd.f32 %v1045_v32, %v2774_v39  ;;  %v1046_v36 = vmul.f32 %v1033_v35, %v2916_v15  ;;  %v998_v4 = vmul.f32 0.5, %v985_v23 }
 0x203   : > { %v2204_v42 = vpop.eup %2203  ;;  %v973_v60 = vmul.f32 %v960_v52, %v2920_v28 }
 0x204   : > { %v1945_v48 = vpack.c.bf16 %v1058_v56, %v1058_v56  ;;  %v1059_v5 = vadd.f32 %v1046_v36, %v2777_v40  ;;  %v1021_v43 = vmul.f32 0.5, %v2204_v42  ;;  %2209 = vtanh.f32 %v998_v4 }
 0x205   : > { %v2206_v2 = vpop.eup %2205  ;;  %v986_v37 = vmul.f32 %v973_v60, %v905_v59 }
 0x206   : > { %1124 = vst [vmem:[#allocation2 + $0x30] sm:$0xf] %v1945_v48  ;;  %v1946_v14 = vpack.c.bf16 %v1059_v5, %v1059_v5  ;;  %v1034_v39 = vadd.f32 0.5, %v1021_v43  ;;  %v1022_v3 = vmul.f32 0.5, %v2206_v2  ;;  %v2978_v2 = vrot.slane %v1176_v38, %v577_v44 }
 0x207   : > { %v999_v15 = vmul.f32 0.5, %v986_v37  ;;  %v2149_v24 = vld [vmem:[#allocation2 + $0x20] ss:$8 sps:$4 sm:$0xff]  }
 0x208   : > { %1125 = vst [vmem:[#allocation2 + $0x38] sm:$0xf] %v1946_v14  ;;  %v1047_v28 = vmul.f32 %v1034_v39, %v2932_v21  ;;  %v1035_v16 = vadd.f32 0.5, %v1022_v3  ;;  %1468 = vmatmul.mubr.bf16.gmra.mrb[8].mxu1 %v2149_v24 }
 0x209   : > { %2211 = vtanh.f32 %v999_v15  ;;  %1477 = vmatprep.mubr.bf16.mxu1 %v2150_v12 }
 0x20a   : > { %v1060_v49 = vadd.f32 %v1047_v28, %v2786_v47  ;;  %v1048_v40 = vmul.f32 %v1035_v16, %v2938_v9 }
 0x20b   : > { %v2208_v26 = vpop.eup %2207 }
 0x20c   : > { %v1947_v6 = vpack.c.bf16 %v1060_v49, %v1060_v49  ;;  %v1061_v7 = vadd.f32 %v1048_v40, %v2789_v50  ;;  %v1023_v13 = vmul.f32 0.5, %v2208_v26 }
 0x20e   : > { %v2210_v63 = vpop.eup %2209  ;;  %1126 = vst [vmem:[#allocation2 + $0x40] sm:$0xf] %v1947_v6  ;;  %v1948_v0 = vpack.c.bf16 %v1061_v7, %v1061_v7  ;;  %v1036_v8 = vadd.f32 0.5, %v1023_v13 }
 0x20f   : > { %v1024_v10 = vmul.f32 0.5, %v2210_v63  ;;  %v2152_v21 = vld [vmem:[#allocation2 + $0x30] ss:$8 sps:$4 sm:$0xff]  }
 0x210   : > { %1127 = vst [vmem:[#allocation2 + $0x48] sm:$0xf] %v1948_v0  ;;  %v1049_v17 = vmul.f32 %v1036_v8, %v984_v33  ;;  %1478 = vmatmul.mubr.bf16.gmra.mrb[12].mxu1 %v2152_v21  ;;  %v2239_v0 = vld [vmem:[%s2715_s16] sm:$0xff] }
 0x211   : > { %v1037_v18 = vadd.f32 0.5, %v1024_v10  ;;  %1487 = vmatprep.mubr.bf16.mxu1 %v2153_v29 }
 0x212   : > { %v1062_v47 = vadd.f32 %v1049_v17, %v2798_v57  ;;  %v2156_v57 = vld [vmem:[#allocation2 + $0x54] ss:$8 sps:$4 sm:$0xff]  }
 0x213   : > { %v2212_v9 = vpop.eup %2211  ;;  %v1050_v22 = vmul.f32 %v1037_v18, %v985_v23 }
 0x214   : > { %v1949_v11 = vpack.c.bf16 %v1062_v47, %v1062_v47  ;;  %v1025_v25 = vmul.f32 0.5, %v2212_v9  ;;  %v2240_v9 = vld [vmem:[%s2715_s16 + $0x8] sm:$0xff] }
 0x215   : > { %v1063_v50 = vadd.f32 %v1050_v22, %v2801_v58 }
 0x216   : > { %1128 = vst [vmem:[#allocation2 + $0x50] sm:$0xf] %v1949_v11  ;;  %v1038_v27 = vadd.f32 0.5, %v1025_v25 }
 0x217   : > { %v1950_v53 = vpack.c.bf16 %v1063_v50, %v1063_v50  ;;  %v2155_v30 = vld [vmem:[#allocation2 + $0x40] ss:$8 sps:$4 sm:$0xff]  }
 0x218   : > { %v1051_v31 = vmul.f32 %v1038_v27, %v986_v37  ;;  %1488 = vmatmul.mubr.bf16.gmra.mrb[16].mxu1 %v2155_v30 }
 0x219   : > { %1129 = vst [vmem:[#allocation2 + $0x58] sm:$0xf] %v1950_v53  ;;  %1497 = vmatprep.mubr.bf16.mxu1 %v2156_v57 }
 0x21a   : > { %v1064_v33 = vadd.f32 %v1051_v31, %v2810_v1 }
 0x21c   : > { %v1951_v54 = vpack.c.bf16 %v1064_v33, %v1064_v33 }
 0x21e   : > { %1130 = vst [vmem:[#allocation2 + $0x60] sm:$0xf] %v1951_v54 }
 0x220   : > { %v2158_v34 = vld [vmem:[#allocation2 + $0x50] ss:$8 sps:$4 sm:$0xff]  }
 0x221   : > { %1498 = vmatmul.mubr.bf16.gmra.mrb[20].mxu1 %v2158_v34 }
 0x225   : > { %v1143_v62 = vld [vmem:[#allocation2 + $0x60] sm:$0xff] }
 0x226   : > { %v1871_v41 = vcombine.high %v1143_v62, %v1143_v62  ;;  %v1870_v58 = vcombine.low %v1143_v62, %v1143_v62 }
 0x228   : > { %1507 = vmatprep.mubr.bf16.mxu1 %v1871_v41 }
 0x229   : > { %1508 = vmatmul.mubr.bf16.gmra.mrb[24].mxu1 %v1870_v58  ;;  %v2241_v58 = vld [vmem:[%s2715_s16 + $0x10] sm:$0xff] }
 0x2cb   : > { %v1449_v1 = vpop.f32.mrb[0].mxu1 }
 0x2cc   : > { %v1450_v61 = vadd.f32 %v1449_v1, %v2970_v45  ;;  %v1451_v46 = vpop.f32.mrb[1].mxu1 }
 0x2cd   : > { %v1453_v32 = vpop.f32.mrb[2].mxu1  ;;  %v1452_v44 = vadd.f32 %v1451_v46, %v2978_v2 }
 0x2ce   : > { %v1516_v35 = vmul.f32 0.5, %v1450_v61  ;;  %v1454_v23 = vadd.f32 %v1453_v32, %v2970_v45  ;;  %v1455_v51 = vpop.f32.mrb[3].mxu1 }
 0x2cf   : > { %v1456_v13 = vadd.f32 %v1455_v51, %v2978_v2  ;;  %v2242_v51 = vld [vmem:[%s2715_s16 + $0x18] sm:$0xff] }
 0x2d0   : > { %2213 = vtanh.f32 %v1516_v35  ;;  %v1517_v52 = vmul.f32 0.5, %v1454_v23 }
 0x2d2   : > { %2215 = vtanh.f32 %v1517_v52 }
 0x2d3   : > { %v1459_v56 = vpop.f32.mrb[4].mxu1 }
 0x2d4   : > { %v1460_v36 = vadd.f32 %v1459_v56, %v2970_v45  ;;  %v1461_v4 = vpop.f32.mrb[5].mxu1 }
 0x2d5   : > { %v1463_v42 = vpop.f32.mrb[6].mxu1  ;;  %v1462_v31 = vadd.f32 %v1461_v4, %v2978_v2 }
 0x2d6   : > { %v1518_v60 = vmul.f32 0.5, %v1460_v36  ;;  %v1464_v20 = vadd.f32 %v1463_v42, %v2970_v45  ;;  %v1465_v59 = vpop.f32.mrb[7].mxu1 }
 0x2d7   : > { %v1466_v62 = vadd.f32 %v1465_v59, %v2978_v2 }
 0x2d8   : > { %2217 = vtanh.f32 %v1518_v60  ;;  %v1519_v48 = vmul.f32 0.5, %v1464_v20 }
 0x2da   : > { %v2214_v5 = vpop.eup %2213  ;;  %2219 = vtanh.f32 %v1519_v48 }
 0x2db   : > { %v1542_v43 = vmul.f32 0.5, %v2214_v5  ;;  %v1469_v37 = vpop.f32.mrb[8].mxu1 }
 0x2dc   : > { %v2216_v14 = vpop.eup %2215  ;;  %v2981_v39 = vadd.f32 %v1469_v37, %v2970_v45  ;;  %v2983_v3 = vpop.f32.mrb[9].mxu1 }
 0x2dd   : > { %v1555_v15 = vadd.f32 0.5, %v1542_v43  ;;  %v1543_v55 = vmul.f32 0.5, %v2216_v14  ;;  %v1473_v24 = vpop.f32.mrb[10].mxu1  ;;  %v1472_v48 = vadd.f32 %v2983_v3, %v2978_v2 }
 0x2de   : > { %v1520_v28 = vmul.f32 0.5, %v2981_v39  ;;  %v2987_v16 = vadd.f32 %v1473_v24, %v2970_v45  ;;  %v2989_v49 = vpop.f32.mrb[11].mxu1  ;;  %v2243_v24 = vld [vmem:[%s2715_s16 + $0x20] sm:$0xff] }
 0x2df   : > { %v1568_v19 = vmul.f32 %v1555_v15, %v1450_v61  ;;  %v1556_v40 = vadd.f32 0.5, %v1543_v55  ;;  %v1476_v15 = vadd.f32 %v2989_v49, %v2978_v2 }
 0x2e0   : > { %2221 = vtanh.f32 %v1520_v28  ;;  %v1521_v26 = vmul.f32 0.5, %v2987_v16 }
 0x2e1   : > { %v1581_v6 = vmul.f32 %v1568_v19, %v1452_v44  ;;  %v1569_v7 = vmul.f32 %v1556_v40, %v1454_v23 }
 0x2e2   : > { %v2218_v63 = vpop.eup %2217  ;;  %2223 = vtanh.f32 %v1521_v26 }
 0x2e3   : > { %v1594_v8 = vadd.f32 %v2239_v0, %v1581_v6  ;;  %v1582_v10 = vmul.f32 %v1569_v7, %v1456_v13  ;;  %v1544_v12 = vmul.f32 0.5, %v2218_v63  ;;  %v1479_v21 = vpop.f32.mrb[12].mxu1  ;;  %v2244_v6 = vld [vmem:[%s2715_s16 + $0x28] sm:$0xff] }
 0x2e4   : > { %v2220_v17 = vpop.eup %2219  ;;  %v2996_v18 = vadd.f32 %v1479_v21, %v2970_v45  ;;  %v2998_v47 = vpop.f32.mrb[13].mxu1 }
 0x2e5   : > { %1607 = vst [vmem:[%s3001_s12] sm:$0xff] %v1594_v8  ;;  %v1595_v22 = vadd.f32 %v2240_v9, %v1582_v10  ;;  %v1557_v11 = vadd.f32 0.5, %v1544_v12  ;;  %v1545_v25 = vmul.f32 0.5, %v2220_v17  ;;  %v1483_v50 = vpop.f32.mrb[14].mxu1  ;;  %v1482_v12 = vadd.f32 %v2998_v47, %v2978_v2 }
 0x2e6   : > { %v1522_v27 = vmul.f32 0.5, %v2996_v18  ;;  %v3007_v53 = vadd.f32 %v1483_v50, %v2970_v45  ;;  %v3009_v29 = vpop.f32.mrb[15].mxu1  ;;  %v2245_v50 = vld [vmem:[%s2715_s16 + $0x30] sm:$0xff] }
 0x2e7   : > { %1608 = vst [vmem:[%s3001_s12 + $0x8] sm:$0xff] %v1595_v22  ;;  %v1570_v30 = vmul.f32 %v1557_v11, %v1460_v36  ;;  %v1558_v33 = vadd.f32 0.5, %v1545_v25  ;;  %v1486_v11 = vadd.f32 %v3009_v29, %v2978_v2 }
 0x2e8   : > { %2225 = vtanh.f32 %v1522_v27  ;;  %v1523_v54 = vmul.f32 0.5, %v3007_v53 }
 0x2e9   : > { %v1583_v57 = vmul.f32 %v1570_v30, %v1462_v31  ;;  %v1571_v34 = vmul.f32 %v1558_v33, %v1464_v20 }
 0x2ea   : > { %v2222_v41 = vpop.eup %2221  ;;  %2227 = vtanh.f32 %v1523_v54 }
 0x2eb   : > { %v1596_v38 = vadd.f32 %v2241_v58, %v1583_v57  ;;  %v1584_v1 = vmul.f32 %v1571_v34, %v1466_v62  ;;  %v1546_v61 = vmul.f32 0.5, %v2222_v41  ;;  %v1489_v46 = vpop.f32.mrb[16].mxu1  ;;  %v2246_v57 = vld [vmem:[%s2715_s16 + $0x38] sm:$0xff] }
 0x2ec   : > { %v2224_v32 = vpop.eup %2223  ;;  %v3017_v35 = vadd.f32 %v1489_v46, %v2970_v45  ;;  %v3019_v23 = vpop.f32.mrb[17].mxu1 }
 0x2ed   : > { %1609 = vst [vmem:[%s3001_s12 + $0x10] sm:$0xff] %v1596_v38  ;;  %v1597_v52 = vadd.f32 %v2242_v51, %v1584_v1  ;;  %v1559_v56 = vadd.f32 0.5, %v1546_v61  ;;  %v1547_v36 = vmul.f32 0.5, %v2224_v32  ;;  %v1493_v4 = vpop.f32.mrb[18].mxu1  ;;  %v1492_v1 = vadd.f32 %v3019_v23, %v2978_v2 }
 0x2ee   : > { %v1524_v42 = vmul.f32 0.5, %v3017_v35  ;;  %v3025_v60 = vadd.f32 %v1493_v4, %v2970_v45  ;;  %v3027_v20 = vpop.f32.mrb[19].mxu1 }
 0x2ef   : > { %1610 = vst [vmem:[%s3001_s12 + $0x18] sm:$0xff] %v1597_v52  ;;  %v1572_v59 = vmul.f32 %v1559_v56, %v2981_v39  ;;  %v1560_v5 = vadd.f32 0.5, %v1547_v36  ;;  %v1496_v32 = vadd.f32 %v3027_v20, %v2978_v2  ;;  %v2247_v52 = vld [vmem:[%s2715_s16 + $0x40] sm:$0xff] }
 0x2f0   : > { %2229 = vtanh.f32 %v1524_v42  ;;  %v1525_v43 = vmul.f32 0.5, %v3025_v60 }
 0x2f1   : > { %v1585_v37 = vmul.f32 %v1572_v59, %v1472_v48  ;;  %v1573_v14 = vmul.f32 %v1560_v5, %v2987_v16 }
 0x2f2   : > { %v2226_v55 = vpop.eup %2225  ;;  %2231 = vtanh.f32 %v1525_v43 }
 0x2f3   : > { %v1598_v28 = vadd.f32 %v2243_v24, %v1585_v37  ;;  %v1586_v39 = vmul.f32 %v1573_v14, %v1476_v15  ;;  %v1548_v19 = vmul.f32 0.5, %v2226_v55  ;;  %v2249_v55 = vld [vmem:[%s2715_s16 + $0x50] sm:$0xff] }
 0x2f4   : > { %v1499_v3 = vpop.f32.mrb[20].mxu1  ;;  %v2228_v44 = vpop.eup %2227 }
 0x2f5   : > { %v1500_v40 = vadd.f32 %v1499_v3, %v2970_v45  ;;  %v1501_v26 = vpop.f32.mrb[21].mxu1  ;;  %1611 = vst [vmem:[%s3001_s12 + $0x20] sm:$0xff] %v1598_v28  ;;  %v1599_v7 = vadd.f32 %v2244_v6, %v1586_v39  ;;  %v1561_v13 = vadd.f32 0.5, %v1548_v19  ;;  %v1549_v16 = vmul.f32 0.5, %v2228_v44  ;;  %v2250_v19 = vld [vmem:[%s2715_s16 + $0x58] sm:$0xff] }
 0x2f6   : > { %v1503_v63 = vpop.f32.mrb[22].mxu1  ;;  %v1502_v5 = vadd.f32 %v1501_v26, %v2978_v2 }
 0x2f7   : > { %v1526_v49 = vmul.f32 0.5, %v1500_v40  ;;  %v1504_v0 = vadd.f32 %v1503_v63, %v2970_v45  ;;  %v1505_v8 = vpop.f32.mrb[23].mxu1  ;;  %1612 = vst [vmem:[%s3001_s12 + $0x28] sm:$0xff] %v1599_v7  ;;  %v1574_v10 = vmul.f32 %v1561_v13, %v2996_v18  ;;  %v1562_v21 = vadd.f32 0.5, %v1549_v16  ;;  %v2251_v7 = vld [vmem:[%s2715_s16 + $0x60] sm:$0xff] }
 0x2f8   : > { %v1506_v14 = vadd.f32 %v1505_v8, %v2978_v2 }
 0x2f9   : > { %2233 = vtanh.f32 %v1526_v49  ;;  %v1527_v17 = vmul.f32 0.5, %v1504_v0  ;;  %v1587_v9 = vmul.f32 %v1574_v10, %v1482_v12  ;;  %v1575_v22 = vmul.f32 %v1562_v21, %v3007_v53 }
 0x2fa   : > { %v2230_v25 = vpop.eup %2229 }
 0x2fb   : > { %2235 = vtanh.f32 %v1527_v17  ;;  %v1600_v27 = vadd.f32 %v2245_v50, %v1587_v9  ;;  %v1588_v18 = vmul.f32 %v1575_v22, %v1486_v11  ;;  %v1550_v30 = vmul.f32 0.5, %v2230_v25 }
 0x2fc   : > { %v1509_v31 = vpop.f32.mrb[24].mxu1  ;;  %v2232_v47 = vpop.eup %2231 }
 0x2fd   : > { %v1510_v33 = vadd.f32 %v1509_v31, %v2970_v45  ;;  %v1511_v54 = vpop.f32.mrb[25].mxu1  ;;  %1613 = vst [vmem:[%s3001_s12 + $0x30] sm:$0xff] %v1600_v27  ;;  %v1601_v34 = vadd.f32 %v2246_v57, %v1588_v18  ;;  %v1563_v53 = vadd.f32 0.5, %v1550_v30  ;;  %v1551_v62 = vmul.f32 0.5, %v2232_v47 }
 0x2fe   : > { %v1513_v41 = vpop.f32.mrb[26].mxu1  ;;  %v1512_v26 = vadd.f32 %v1511_v54, %v2978_v2 }
 0x2ff   : > { %v1528_v29 = vmul.f32 0.5, %v1510_v33  ;;  %v1514_v58 = vpop.f32.mrb[27].mxu1  ;;  %1614 = vst [vmem:[%s3001_s12 + $0x38] sm:$0xff] %v1601_v34  ;;  %v1576_v38 = vmul.f32 %v1563_v53, %v3017_v35  ;;  %v1564_v61 = vadd.f32 0.5, %v1551_v62  ;;  %v2248_v35 = vld [vmem:[%s2715_s16 + $0x48] sm:$0xff] }
 0x301   : > { %2237 = vtanh.f32 %v1528_v29  ;;  %v1589_v45 = vmul.f32 %v1576_v38, %v1492_v1  ;;  %v1577_v46 = vmul.f32 %v1564_v61, %v3025_v60 }
 0x303   : > { %v2234_v51 = vpop.eup %2233  ;;  %v1602_v56 = vadd.f32 %v2247_v52, %v1589_v45  ;;  %v1590_v36 = vmul.f32 %v1577_v46, %v1496_v32 }
 0x304   : > { %v1552_v4 = vmul.f32 0.5, %v2234_v51 }
 0x305   : > { %v2236_v42 = vpop.eup %2235  ;;  %1615 = vst [vmem:[%s3001_s12 + $0x40] sm:$0xff] %v1602_v56  ;;  %v1603_v23 = vadd.f32 %v2248_v35, %v1590_v36 }
 0x306   : > { %v1565_v59 = vadd.f32 0.5, %v1552_v4  ;;  %v1553_v48 = vmul.f32 0.5, %v2236_v42 }
 0x307   : > { %1616 = vst [vmem:[%s3001_s12 + $0x48] sm:$0xff] %v1603_v23 }
 0x308   : > { %v1578_v60 = vmul.f32 %v1565_v59, %v1500_v40  ;;  %v1566_v20 = vadd.f32 0.5, %v1553_v48 }
 0x30a   : > { %v1591_v43 = vmul.f32 %v1578_v60, %v1502_v5  ;;  %v1579_v37 = vmul.f32 %v1566_v20, %v1504_v0 }
 0x30b   : > { %v2238_v15 = vpop.eup %2237 }
 0x30c   : > { %v1604_v24 = vadd.f32 %v2249_v55, %v1591_v43  ;;  %v1592_v28 = vmul.f32 %v1579_v37, %v1506_v14  ;;  %v1554_v39 = vmul.f32 0.5, %v2238_v15 }
 0x30e   : > { %1617 = vst [vmem:[%s3001_s12 + $0x50] sm:$0xff] %v1604_v24  ;;  %v1605_v3 = vadd.f32 %v2250_v19, %v1592_v28  ;;  %v1567_v44 = vadd.f32 0.5, %v1554_v39 }
 0x310   : > { %1618 = vst [vmem:[%s3001_s12 + $0x58] sm:$0xff] %v1605_v3  ;;  %v1580_v40 = vmul.f32 %v1567_v44, %v1510_v33  ;;  %1627 = sbr.rel (!%p3164_p0) target bundleno = 819 (0x333), region = 64 }
 0x312   : > { %v1593_v6 = vmul.f32 %v1580_v40, %v1512_v26 }
 0x314   : > { %v1606_v13 = vadd.f32 %v2251_v7, %v1593_v6 }
 0x316   : > { %1619 = vst [vmem:[%s3001_s12 + $0x60] sm:$0xff] %v1606_v13 }
 0x317   : > { %s3176_s29 = smov (!%p1630_p12, %s1629_s29), 13 }
 0x318   : > { %s3077_s27 = sshll.u32 %s3176_s29, 7 }
 0x319   : > { %s1634_s18 = ssub.s32 1664, %s3077_s27 }
 0x31a   : > { %1635 = vsyncadd %s1621_s14, %s1634_s18  ;;  %p1905_p7 = scmp.ne.s32.totalorder %s3077_s27, 0  ;;  %s1952_s9 = smul.u32 1664, %s2513_s25 }
 0x31b   : > { %s1640_s20 = sshll.u32 %s3001_s12, 4  ;;  %s2454_s13 = smov [#allocation11]   ;;  %s3090_s20 = int_to_ptr.vmem [resolvable:$true] %s1640_s20 }
 0x31c   : > { %s3088_s11 = scalar_lea.hbm %s3142_s6, %s1952_s9  ;;  %s2364_s28 = scalar_lea.vmem %s3090_s20, %s3077_s27 }
 0x31d   : > { %p2365_p8 = scmp.ne.s32.totalorder %s3090_s20, %s2364_s28  ;;  %s2368_s8 = sshll.u32 %s2454_s13, 4  ;;  %s2369_s8 = int_to_ptr.vmem [resolvable:$false] %s2368_s8 }
 0x31e   : > { %s2370_s25 = scalar_lea.vmem %s2369_s8, 3328  ;;  %p2371_p3 = scmp.lt.s32.totalorder %s3090_s20, %s2369_s8 }
 0x31f   : > { %p2366_p9 = pnand %p2365_p8, %p1905_p7  ;;  %p2372_p10 = scmp.lt.s32.totalorder %s2370_s25, %s2364_s28 }
 0x321   : > { %p2367_p1 = pneg %p2366_p9  ;;  %p2373_p5 = por %p2372_p10, %p2371_p3 }
 0x323   : > { %p2374_p2 = pnand %p2373_p5, %p2367_p1 }
 0x325   : > { %2377 = shalt.err (!%p2374_p2)
}
 0x326   : > { %s2378_s15 = scalar_lea.hbm %s3088_s11, %s3077_s27  ;;  %s2382_s12 = scalar_lea.hbm %s3142_s6, 3200 }
 0x327   : > { %p2379_p6 = scmp.ne.s32.totalorder %s3088_s11, %s2378_s15  ;;  %p2383_p0 = scmp.lt.u32.totalorder %s3088_s11, %s3142_s6 }
 0x328   : > { %p2384_p12 = scmp.lt.u32.totalorder %s2382_s12, %s2378_s15  ;;  %p2386_p9 = scmp.lt.u32.totalorder %s2378_s15, %s3088_s11 }
 0x329   : > { %p2380_p11 = pnand %p2379_p6, %p1905_p7 }
 0x32a   : > { %p2385_p8 = por %p2384_p12, %p2383_p0 }
 0x32b   : > { %p2381_p13 = pneg %p2380_p11 }
 0x32c   : > { %p2387_p1 = por %p2386_p9, %p2385_p8 }
 0x32e   : > { %p2388_p3 = pnand %p2387_p1, %p2381_p13 }
 0x330   : > { %2391 = shalt.err (!%p2388_p3)
}
 0x331   : > { %s2455_s18 = smov 128   ;;  %s2456_s9 = smov 8  }
 0x332   : > { %1646 = dma.vmem_to_hbm [thread:$0]  (%p1905_p7), %s3090_s20, %s3077_s27, %s3088_s11, %s1621_s14, %s2455_s18, %s2455_s18, %s2456_s9  }
 0x333 PF: > { %s1655_s26 = sand.u32 1, %s2430_s21   ;;  %p3165_p10 = scmp.ne.s32.totalorder %s3153_s10, 0 }
 0x334   : > { %s1656_s16 = scalar_lea.sflag [#allocation5], %s1655_s26 }
 0x335   : > { %p1975_p5 = pnand %p1759_p4, %p3165_p10 }
 0x337   : > { %2425 = dma.done.wait (!%p1975_p5), %s1656_s16, 1664  }
 0x338   : > { %2427 = vsyncadd (!%p1975_p5), %s1656_s16, 4294965632  ;;  %s3166_s24 = sld [smem:[#allocation17_spill]]  ;;  %s3167_s28 = sld [smem:[#allocation18_spill]] }
 0x339   : > { %s3168_s21 = smov %s2434_s22  ;;  %s3169_s22 = smov %s2438_s23 }
 0x33e   : > { %p23_p2 = scmp.ge.s32.totalorder %s3166_s24, 4   ;;  %s3170_s23 = smov %s3167_s28 }
 0x340   :  { %25 = sbr.rel (!%p23_p2) target bundleno = 8 (0x8), region = 110 }
 0x347   :  { %1661 = vsyncpa [#allocation4], 1 }
 0x348   :  { %1663 = vsyncpa [#allocation4 + $0x1], 1 }
 0x349   :  { %1664 = vsyncpa [#allocation7], 1 }
 0x34a   :  { %1666 = vsyncpa [#allocation7 + $0x1], 1 }
 0x34b   :  { %1667 = vsyncpa [#allocation10], 1 }
 0x34c   :  { %1668 = vsyncpa [#allocation5], 1 }
 0x34d   :  { %1670 = vsyncpa [#allocation5 + $0x1], 1 }

</bundles_post_ra>
